<compile_context>
chip_gen: v7x
topology: tpu7x:2x2x1
jax: 0.10.0
libtpu: 0.0.40
codegen_flags: <defaults>
</compile_context>

<pallas_src>
import functools

import jax
import jax.numpy as jnp
from jax import lax
from jax.experimental import pallas as pl
from jax.experimental.pallas import tpu as pltpu

_NEG = -1.0e30  # finite "-inf": keeps masked-row/col arithmetic NaN-free.


def _round_up(x, m):
    return (x + m - 1) // m * m


def _clip_loss_kernel(scale_ref, img_ref, txt_ref, loss_ref,
                      m_r, l_r, diag_r, row_acc,
                      m_c, l_c, diag_c, col_acc,
                      *, block, n_total, needs_mask):
    i = pl.program_id(0)          # row tile    (image side) -- outer
    j = pl.program_id(1)          # column tile (text side)  -- inner
    ni = pl.num_programs(0)
    nj = pl.num_programs(1)
    t = block

    # ---------------- init resident accumulators --------------------------------
    @pl.when(jnp.logical_and(i == 0, j == 0))
    def _init_global():
        row_acc[...] = jnp.zeros(row_acc.shape, jnp.float32)
        col_acc[...] = jnp.zeros(col_acc.shape, jnp.float32)
        m_c[...] = jnp.full(m_c.shape, _NEG, jnp.float32)
        l_c[...] = jnp.zeros(l_c.shape, jnp.float32)
        diag_c[...] = jnp.zeros(diag_c.shape, jnp.float32)

    @pl.when(j == 0)                    # new row tile: reset row-wise LSE state
    def _init_row():
        m_r[...] = jnp.full(m_r.shape, _NEG, jnp.float32)
        l_r[...] = jnp.zeros(l_r.shape, jnp.float32)

    # ---------------- logits tile on the MXU -------------------------------------
    col0 = pl.multiple_of(j * t, 128)
    img = img_ref[...]                    # (t, d) in input dtype (bf16 -> bf16 MXU)
    txt = txt_ref[pl.ds(col0, t), :]      # (t, d) slice of the VMEM-resident text
    s = lax.dot_general(
        img, txt,
        dimension_numbers=(((1,), (1,)), ((), ())),      # img @ txt.T, no transpose
        preferred_element_type=jnp.float32,
    )                                                    # (t, t) f32
    # Apply logit_scale on the f32 logits (NOT folded into a low-precision operand).
    s = s * scale_ref[0, 0]

    if needs_mask:
        rid = lax.broadcasted_iota(jnp.int32, (t, t), 0) + i * t
        cid = lax.broadcasted_iota(jnp.int32, (t, t), 1) + col0
        s = jnp.where(jnp.logical_and(rid < n_total, cid < n_total), s, _NEG)

    # ---------------- diagonal (label) logits: only the i == j tiles --------------
    @pl.when(i == j)
    def _diag():
        rl = lax.broadcasted_iota(jnp.int32, (t, t), 0)
        cl = lax.broadcasted_iota(jnp.int32, (t, t), 1)
        d = jnp.where(rl == cl, s, 0.0)
        diag_r[...] = jnp.sum(d, axis=1, keepdims=True)   # (t, 1) row layout
        diag_c[j] = jnp.sum(d, axis=0, keepdims=True)     # (1, t) column layout

    # ---------------- online softmax, row direction (image -> text CE) ------------
    row_max = jnp.max(s, axis=1, keepdims=True)                       # (t, 1)
    m_r_new = jnp.maximum(m_r[...], row_max)
    l_r[...] = (jnp.exp(m_r[...] - m_r_new) * l_r[...]
                + jnp.sum(jnp.exp(s - m_r_new), axis=1, keepdims=True))
    m_r[...] = m_r_new

    # ---------------- online softmax, column direction (text -> image CE) ---------
    # TODO(synk): if EUP/XLU turns out binding at small D, derive these sums via
    #             ones @ p / p @ ones on the (idle) MXU instead.
    col_max = jnp.max(s, axis=0, keepdims=True)                       # (1, t)
    m_c_old = m_c[j]
    m_c_new = jnp.maximum(m_c_old, col_max)
    l_c[j] = (jnp.exp(m_c_old - m_c_new) * l_c[j]
              + jnp.sum(jnp.exp(s - m_c_new), axis=0, keepdims=True))
    m_c[j] = m_c_new

    # ---------------- finalize row tile after its last column tile ----------------
    @pl.when(j == nj - 1)
    def _row_final():
        lse_r = jnp.log(l_r[...]) + m_r[...]
        contrib = lse_r - diag_r[...]                      # per-element subtraction
        if needs_mask:
            rvalid = (lax.broadcasted_iota(jnp.int32, (t, 1), 0) + i * t) < n_total
            contrib = jnp.where(rvalid, contrib, 0.0)
        row_acc[...] += contrib

    # ---------------- finalize column tile after the last row tile ----------------
    @pl.when(i == ni - 1)
    def _col_final():
        lse_c = jnp.log(l_c[j]) + m_c[j]
        contrib = lse_c - diag_c[j]
        if needs_mask:
            cvalid = (lax.broadcasted_iota(jnp.int32, (1, t), 1) + col0) < n_total
            contrib = jnp.where(cvalid, contrib, 0.0)
        col_acc[...] += contrib

    # ---------------- final scalar loss -------------------------------------------
    @pl.when(jnp.logical_and(i == ni - 1, j == nj - 1))
    def _finalize():
        total = jnp.sum(row_acc[...]) + jnp.sum(col_acc[...])
        loss_ref[0, 0] = total / (2.0 * n_total)


def clip_loss(image_features, text_features, logit_scale, block_size=None):
    """ClipLoss.forward for world_size=1. Returns a scalar f32 loss."""
    n, d = image_features.shape
    assert text_features.shape == (n, d), "world_size=1 ClipLoss expects matching shapes"

    if block_size is None:
        # v6e/v7x MXUs are 2x256x256: prefer >=256 (512 when it fits); 128 only
        # matters for v5e's 4x128x128 MXUs / small batches.
        block_size = min(512, _round_up(n, 128))
    t = int(block_size)
    assert t % 128 == 0 and t > 0, "block_size must be a positive multiple of 128"

    n_pad = _round_up(n, t)
    nt = n_pad // t
    needs_mask = (n_pad != n)
    if needs_mask:
        pad = n_pad - n
        image_features = jnp.pad(image_features, ((0, pad), (0, 0)))
        text_features = jnp.pad(text_features, ((0, pad), (0, 0)))

    itemsize = jnp.dtype(image_features.dtype).itemsize
    scale_arr = jnp.asarray(logit_scale, dtype=jnp.float32).reshape(1, 1)

    try:
        vmem_cap = int(pltpu.get_tpu_info().vmem_capacity_bytes)
    except Exception:                       # not queryable -> assume v7x-safe 64 MiB
        vmem_cap = 64 * 1024 * 1024

    # VMEM budget: resident text (x2 in case the pipeline reserves two revolving
    # buffers for the constant-index block), double-buffered image tiles, f32
    # logits/exp temporaries, column stats (sublane-padded 1->8), row stats.
    est = (2 * n_pad * d * itemsize
           + 2 * 2 * t * d * itemsize
           + 8 * t * t * 4
           + 4 * nt * 8 * t * 4
           + 8 * t * 4)
    # TODO(synk): streamed-text fallback (2-D BlockSpec over text) when the resident
    #             footprint exceeds VMEM (very large N on v7x's 64 MiB).
    assert est <= int(0.9 * vmem_cap), (
        f"resident-text tiling needs ~{est / 2**20:.1f} MiB VMEM "
        f"(cap {vmem_cap / 2**20:.0f} MiB); shrink block_size or batch")
    vmem_limit = int(min(vmem_cap, max(32 * 1024 * 1024, est + (8 << 20))))

    cost = pl.CostEstimate(
        flops=2 * n_pad * n_pad * d + 12 * n_pad * n_pad,
        transcendentals=2 * n_pad * n_pad + 4 * n_pad,
        # Text and image features each cross HBM exactly once now.
        bytes_accessed=2 * n_pad * d * itemsize + 8,
    )

    grid_spec = pltpu.PrefetchScalarGridSpec(
        num_scalar_prefetch=0,
        grid=(nt, nt),                                       # j (columns) innermost
        in_specs=[
            pl.BlockSpec(memory_space=pltpu.SMEM),              # logit_scale (1, 1)
            pl.BlockSpec((t, d), lambda i, j: (i, 0)),          # image rows: per i
            pl.BlockSpec((n_pad, d), lambda i, j: (0, 0)),      # text: resident, DMA'd once
        ],
        out_specs=pl.BlockSpec(memory_space=pltpu.SMEM),        # scalar loss (1, 1)
        scratch_shapes=[
            pltpu.VMEM((t, 1), jnp.float32),        # m_r     row running max
            pltpu.VMEM((t, 1), jnp.float32),        # l_r     row running sum
            pltpu.VMEM((t, 1), jnp.float32),        # diag_r  current row-tile diagonal
            pltpu.VMEM((t, 1), jnp.float32),        # row_acc per-row (lse - diag)
            pltpu.VMEM((nt, 1, t), jnp.float32),    # m_c     col running max (resident)
            pltpu.VMEM((nt, 1, t), jnp.float32),    # l_c     col running sum (resident)
            pltpu.VMEM((nt, 1, t), jnp.float32),    # diag_c  per-column-tile diagonal
            pltpu.VMEM((1, t), jnp.float32),        # col_acc per-col (lse - diag) partials
        ],
    )

    out = pl.pallas_call(
        functools.partial(_clip_loss_kernel, block=t, n_total=n, needs_mask=needs_mask),
        out_shape=jax.ShapeDtypeStruct((1, 1), jnp.float32),
        grid_spec=grid_spec,
        compiler_params=pltpu.CompilerParams(
            # Row LSE state is carried across j, column LSE/diag state across i, so
            # both axes must stay sequential in this single-pass formulation.
            # TODO(synk): v7x dual-TC needs per-core privatized column stats (or a
            #             two-pass form) before either axis can be "parallel".
            dimension_semantics=("arbitrary", "arbitrary"),
            vmem_limit_bytes=vmem_limit,
        ),
        cost_estimate=cost,
    )(scale_arr, image_features, text_features)
    return out[0, 0]


def _clip_loss_ref(image_features, text_features, logit_scale):
    """Pure-JAX (f32) reference matching the PyTorch module semantics."""
    img = image_features.astype(jnp.float32)
    txt = text_features.astype(jnp.float32)
    logits_per_image = logit_scale * img @ txt.T
    logits_per_text = logit_scale * txt @ img.T
    labels = jnp.arange(img.shape[0])

    def ce(logits):
        logp = jax.nn.log_softmax(logits, axis=-1)
        return -jnp.mean(logp[jnp.arange(logits.shape[0]), labels])

    return 0.5 * (ce(logits_per_image) + ce(logits_per_text))


def _clip_loss_ref_bf16_logits(image_features, text_features, logit_scale):
    """Reference mirroring the kernel's bf16-operand / f32-accumulate logits."""
    logits = logit_scale * jnp.dot(image_features, text_features.T,
                                   preferred_element_type=jnp.float32)
    labels = jnp.arange(image_features.shape[0])

    def ce(lg):
        logp = jax.nn.log_softmax(lg, axis=-1)
        return -jnp.mean(logp[jnp.arange(lg.shape[0]), labels])

    return 0.5 * (ce(logits) + ce(logits.T))


if __name__ == "__main__":
    key = jax.random.PRNGKey(0)
    k_img, k_txt = jax.random.split(key)
    logit_scale = jnp.exp(jnp.float32(jnp.log(1.0 / 0.07)))   # deterministic CLIP init

    # ---- test 1: f32 features, non-divisible batch (exercises padding + tail
    #              masking, 2x2 tile grid, row/column carries, diagonal tiles) ----
    N, D = 200, 128
    img = jax.random.normal(k_img, (N, D), dtype=jnp.float32)
    txt = jax.random.normal(k_txt, (N, D), dtype=jnp.float32)
    img = img / jnp.linalg.norm(img, axis=-1, keepdims=True)
    txt = txt / jnp.linalg.norm(txt, axis=-1, keepdims=True)

    loss = jax.block_until_ready(clip_loss(img, txt, logit_scale, block_size=128))
    ref = _clip_loss_ref(img, txt, logit_scale)
    assert jnp.allclose(loss, ref, atol=5e-4, rtol=5e-4), ("f32/padded", loss, ref)

    # ---- test 2: bf16 features (bf16 MXU operands), divisible batch ---------------
    N2, D2 = 256, 128
    img2 = jax.random.normal(k_img, (N2, D2), dtype=jnp.float32)
    txt2 = jax.random.normal(k_txt, (N2, D2), dtype=jnp.float32)
    img2 = (img2 / jnp.linalg.norm(img2, axis=-1, keepdims=True)).astype(jnp.bfloat16)
    txt2 = (txt2 / jnp.linalg.norm(txt2, axis=-1, keepdims=True)).astype(jnp.bfloat16)

    loss2 = jax.block_until_ready(clip_loss(img2, txt2, logit_scale, block_size=128))
    ref2 = _clip_loss_ref_bf16_logits(img2, txt2, logit_scale)
    assert jnp.allclose(loss2, ref2, atol=5e-3, rtol=5e-3), ("bf16", loss2, ref2)

    print("KERNEL_OK")
</pallas_src>

<mosaic_0001>
module attributes {stable_mosaic.version = 11 : i64} {
  func.func @_clip_loss_kernel(%arg0: i32, %arg1: i32, %arg2: memref<1x1xf32, #tpu.memory_space<smem>>, %arg3: memref<128x128xf32, #tpu.memory_space<vmem>>, %arg4: memref<256x128xf32, #tpu.memory_space<vmem>>, %arg5: memref<1x1xf32, #tpu.memory_space<smem>>, %arg6: memref<128x1xf32, #tpu.memory_space<vmem>>, %arg7: memref<128x1xf32, #tpu.memory_space<vmem>>, %arg8: memref<128x1xf32, #tpu.memory_space<vmem>>, %arg9: memref<128x1xf32, #tpu.memory_space<vmem>>, %arg10: memref<2x1x128xf32, #tpu.memory_space<vmem>>, %arg11: memref<2x1x128xf32, #tpu.memory_space<vmem>>, %arg12: memref<2x1x128xf32, #tpu.memory_space<vmem>>, %arg13: memref<1x128xf32, #tpu.memory_space<vmem>>) attributes {dimension_semantics = [#tpu.dimension_semantics<arbitrary>, #tpu.dimension_semantics<arbitrary>], iteration_bounds = array<i64: 2, 2>, scalar_prefetch = 0 : i64, scratch_operands = 8 : i64, tpu.core_type = #tpu.core_type<tc>, window_params = [{transform_indices = @transform_0, window_bounds = array<i64: 1, 1>}, {transform_indices = @transform_1, window_bounds = array<i64: 128, 128>}, {pipeline_mode = #tpu.pipeline_mode<synchronous>, transform_indices = @transform_2, window_bounds = array<i64: 256, 128>}, {transform_indices = @transform_3, window_bounds = array<i64: 1, 1>}]} {
    %c0_i32 = arith.constant 0 : i32
    %0 = arith.cmpi eq, %arg0, %c0_i32 : i32
    %c0_i32_0 = arith.constant 0 : i32
    %1 = arith.cmpi eq, %arg1, %c0_i32_0 : i32
    %2 = arith.andi %0, %1 : i1
    %3 = arith.extui %2 : i1 to i32
    %c0_i32_1 = arith.constant 0 : i32
    %4 = arith.cmpi ne, %3, %c0_i32_1 : i32
    scf.if %4 {
      %cst_40 = arith.constant 0.000000e+00 : f32
      %88 = vector.broadcast %cst_40 : f32 to vector<128x1xf32>
      %c0_41 = arith.constant 0 : index
      %c0_42 = arith.constant 0 : index
      %89 = vector.load %arg9[%c0_41, %c0_42] : memref<128x1xf32, #tpu.memory_space<vmem>>, vector<128x1xf32>
      tpu.vector_store %arg9[%c0_41, %c0_42], %88 {strides = array<i32>} : memref<128x1xf32, #tpu.memory_space<vmem>>, vector<128x1xf32>,
      %cst_43 = arith.constant 0.000000e+00 : f32
      %90 = vector.broadcast %cst_43 : f32 to vector<1x128xf32>
      %c0_44 = arith.constant 0 : index
      %c0_45 = arith.constant 0 : index
      %91 = vector.load %arg13[%c0_44, %c0_45] : memref<1x128xf32, #tpu.memory_space<vmem>>, vector<1x128xf32>
      tpu.vector_store %arg13[%c0_44, %c0_45], %90 {strides = array<i32>} : memref<1x128xf32, #tpu.memory_space<vmem>>, vector<1x128xf32>,
      %cst_46 = arith.constant -1.000000e+30 : f32
      %92 = vector.broadcast %cst_46 : f32 to vector<2x1x128xf32>
      %c0_47 = arith.constant 0 : index
      %c0_48 = arith.constant 0 : index
      %c0_49 = arith.constant 0 : index
      %93 = vector.load %arg10[%c0_47, %c0_48, %c0_49] : memref<2x1x128xf32, #tpu.memory_space<vmem>>, vector<2x1x128xf32>
      tpu.vector_store %arg10[%c0_47, %c0_48, %c0_49], %92 {strides = array<i32>} : memref<2x1x128xf32, #tpu.memory_space<vmem>>, vector<2x1x128xf32>,
      %cst_50 = arith.constant 0.000000e+00 : f32
      %94 = vector.broadcast %cst_50 : f32 to vector<2x1x128xf32>
      %c0_51 = arith.constant 0 : index
      %c0_52 = arith.constant 0 : index
      %c0_53 = arith.constant 0 : index
      %95 = vector.load %arg11[%c0_51, %c0_52, %c0_53] : memref<2x1x128xf32, #tpu.memory_space<vmem>>, vector<2x1x128xf32>
      tpu.vector_store %arg11[%c0_51, %c0_52, %c0_53], %94 {strides = array<i32>} : memref<2x1x128xf32, #tpu.memory_space<vmem>>, vector<2x1x128xf32>,
      %cst_54 = arith.constant 0.000000e+00 : f32
      %96 = vector.broadcast %cst_54 : f32 to vector<2x1x128xf32>
      %c0_55 = arith.constant 0 : index
      %c0_56 = arith.constant 0 : index
      %c0_57 = arith.constant 0 : index
      %97 = vector.load %arg12[%c0_55, %c0_56, %c0_57] : memref<2x1x128xf32, #tpu.memory_space<vmem>>, vector<2x1x128xf32>
      tpu.vector_store %arg12[%c0_55, %c0_56, %c0_57], %96 {strides = array<i32>} : memref<2x1x128xf32, #tpu.memory_space<vmem>>, vector<2x1x128xf32>,
    } else {
    }
    %c0_i32_2 = arith.constant 0 : i32
    %5 = arith.cmpi eq, %arg1, %c0_i32_2 : i32
    %6 = arith.extui %5 : i1 to i32
    %c0_i32_3 = arith.constant 0 : i32
    %7 = arith.cmpi ne, %6, %c0_i32_3 : i32
    scf.if %7 {
      %cst_40 = arith.constant -1.000000e+30 : f32
      %88 = vector.broadcast %cst_40 : f32 to vector<128x1xf32>
      %c0_41 = arith.constant 0 : index
      %c0_42 = arith.constant 0 : index
      %89 = vector.load %arg6[%c0_41, %c0_42] : memref<128x1xf32, #tpu.memory_space<vmem>>, vector<128x1xf32>
      tpu.vector_store %arg6[%c0_41, %c0_42], %88 {strides = array<i32>} : memref<128x1xf32, #tpu.memory_space<vmem>>, vector<128x1xf32>,
      %cst_43 = arith.constant 0.000000e+00 : f32
      %90 = vector.broadcast %cst_43 : f32 to vector<128x1xf32>
      %c0_44 = arith.constant 0 : index
      %c0_45 = arith.constant 0 : index
      %91 = vector.load %arg7[%c0_44, %c0_45] : memref<128x1xf32, #tpu.memory_space<vmem>>, vector<128x1xf32>
      tpu.vector_store %arg7[%c0_44, %c0_45], %90 {strides = array<i32>} : memref<128x1xf32, #tpu.memory_space<vmem>>, vector<128x1xf32>,
    } else {
    }
    %c128_i32 = arith.constant 128 : i32
    %8 = arith.muli %arg1, %c128_i32 : i32
    %9 = tpu.assume_multiple %8, 128 : i32
    %c0 = arith.constant 0 : index
    %c0_4 = arith.constant 0 : index
    %10 = vector.load %arg3[%c0, %c0_4] : memref<128x128xf32, #tpu.memory_space<vmem>>, vector<128x128xf32>
    %11 = arith.index_cast %9 : i32 to index
    %c0_5 = arith.constant 0 : index
    %12 = vector.load %arg4[%11, %c0_5] : memref<256x128xf32, #tpu.memory_space<vmem>>, vector<128x128xf32>
    %cst = arith.constant dense<0.000000e+00> : vector<128x128xf32>
    %13 = tpu.matmul %10, %12, %cst {dimension_numbers = #tpu.dot_dimension_numbers<[1], [1], [0], [0], [0, 0, 1, 0], [], []>} : vector<128x128xf32>, vector<128x128xf32>, vector<128x128xf32> -> vector<128x128xf32>
    %c0_6 = arith.constant 0 : index
    %c0_7 = arith.constant 0 : index
    %14 = memref.load %arg2[%c0_6, %c0_7] : memref<1x1xf32, #tpu.memory_space<smem>>
    %15 = vector.broadcast %14 : f32 to vector<128x128xf32>
    %16 = arith.mulf %13, %15 : vector<128x128xf32>
    %17 = tpu.iota {dimensions = array<i32: 0>} : vector<128x128xi32>
    %c128_i32_8 = arith.constant 128 : i32
    %18 = arith.muli %arg0, %c128_i32_8 : i32
    %19 = vector.broadcast %18 : i32 to vector<128x128xi32>
    %20 = arith.addi %17, %19 : vector<128x128xi32>
    %21 = tpu.iota {dimensions = array<i32: 1>} : vector<128x128xi32>
    %22 = vector.broadcast %9 : i32 to vector<128x128xi32>
    %23 = arith.addi %21, %22 : vector<128x128xi32>
    %c200_i32 = arith.constant 200 : i32
    %24 = vector.broadcast %c200_i32 : i32 to vector<128x128xi32>
    %25 = arith.cmpi slt, %20, %24 : vector<128x128xi32>
    %c200_i32_9 = arith.constant 200 : i32
    %26 = vector.broadcast %c200_i32_9 : i32 to vector<128x128xi32>
    %27 = arith.cmpi slt, %23, %26 : vector<128x128xi32>
    %28 = arith.andi %25, %27 : vector<128x128xi1>
    %cst_10 = arith.constant -1.000000e+30 : f32
    %29 = vector.broadcast %cst_10 : f32 to vector<128x128xf32>
    %30 = arith.select %28, %16, %29 : vector<128x128xi1>, vector<128x128xf32>
    %31 = arith.cmpi eq, %arg0, %arg1 : i32
    %32 = arith.extui %31 : i1 to i32
    %c0_i32_11 = arith.constant 0 : i32
    %33 = arith.cmpi ne, %32, %c0_i32_11 : i32
    scf.if %33 {
      %88 = tpu.iota {dimensions = array<i32: 0>} : vector<128x128xi32>
      %89 = tpu.iota {dimensions = array<i32: 1>} : vector<128x128xi32>
      %90 = arith.cmpi eq, %88, %89 : vector<128x128xi32>
      %cst_40 = arith.constant 0.000000e+00 : f32
      %91 = vector.broadcast %cst_40 : f32 to vector<128x128xf32>
      %92 = arith.select %90, %30, %91 : vector<128x128xi1>, vector<128x128xf32>
      %cst_41 = arith.constant dense<0.000000e+00> : vector<128xf32>
      %93 = vector.multi_reduction <add>, %92, %cst_41 [1] : vector<128x128xf32> to vector<128xf32>
      %94 = vector.shape_cast %93 : vector<128xf32> to vector<128x1xf32>
      %c0_42 = arith.constant 0 : index
      %c0_43 = arith.constant 0 : index
      %95 = vector.load %arg8[%c0_42, %c0_43] : memref<128x1xf32, #tpu.memory_space<vmem>>, vector<128x1xf32>
      tpu.vector_store %arg8[%c0_42, %c0_43], %94 {strides = array<i32>} : memref<128x1xf32, #tpu.memory_space<vmem>>, vector<128x1xf32>,
      %cst_44 = arith.constant dense<0.000000e+00> : vector<128xf32>
      %96 = vector.multi_reduction <add>, %92, %cst_44 [0] : vector<128x128xf32> to vector<128xf32>
      %97 = vector.shape_cast %96 : vector<128xf32> to vector<1x128xf32>
      %98 = arith.index_cast %arg1 : i32 to index
      %c0_45 = arith.constant 0 : index
      %c0_46 = arith.constant 0 : index
      %99 = vector.load %arg12[%98, %c0_45, %c0_46] : memref<2x1x128xf32, #tpu.memory_space<vmem>>, vector<1x1x128xf32>
      %100 = vector.shape_cast %99 : vector<1x1x128xf32> to vector<1x128xf32>
      %101 = vector.shape_cast %97 : vector<1x128xf32> to vector<1x1x128xf32>
      tpu.vector_store %arg12[%98, %c0_45, %c0_46], %101 {strides = array<i32>} : memref<2x1x128xf32, #tpu.memory_space<vmem>>, vector<1x1x128xf32>,
    } else {
    }
    %cst_12 = arith.constant dense<0xFF800000> : vector<128xf32>
    %34 = vector.multi_reduction <maximumf>, %30, %cst_12 [1] : vector<128x128xf32> to vector<128xf32>
    %35 = vector.shape_cast %34 : vector<128xf32> to vector<128x1xf32>
    %c0_13 = arith.constant 0 : index
    %c0_14 = arith.constant 0 : index
    %36 = vector.load %arg6[%c0_13, %c0_14] : memref<128x1xf32, #tpu.memory_space<vmem>>, vector<128x1xf32>
    %37 = arith.maximumf %36, %35 : vector<128x1xf32>
    %c0_15 = arith.constant 0 : index
    %c0_16 = arith.constant 0 : index
    %38 = vector.load %arg6[%c0_15, %c0_16] : memref<128x1xf32, #tpu.memory_space<vmem>>, vector<128x1xf32>
    %39 = arith.subf %38, %37 : vector<128x1xf32>
    %40 = math.exp %39 : vector<128x1xf32>
    %c0_17 = arith.constant 0 : index
    %c0_18 = arith.constant 0 : index
    %41 = vector.load %arg7[%c0_17, %c0_18] : memref<128x1xf32, #tpu.memory_space<vmem>>, vector<128x1xf32>
    %42 = arith.mulf %40, %41 : vector<128x1xf32>
    %43 = vector.broadcast %37 : vector<128x1xf32> to vector<128x128xf32>
    %44 = arith.subf %30, %43 : vector<128x128xf32>
    %45 = math.exp %44 : vector<128x128xf32>
    %cst_19 = arith.constant dense<0.000000e+00> : vector<128xf32>
    %46 = vector.multi_reduction <add>, %45, %cst_19 [1] : vector<128x128xf32> to vector<128xf32>
    %47 = vector.shape_cast %46 : vector<128xf32> to vector<128x1xf32>
    %48 = arith.addf %42, %47 : vector<128x1xf32>
    %c0_20 = arith.constant 0 : index
    %c0_21 = arith.constant 0 : index
    %49 = vector.load %arg7[%c0_20, %c0_21] : memref<128x1xf32, #tpu.memory_space<vmem>>, vector<128x1xf32>
    tpu.vector_store %arg7[%c0_20, %c0_21], %48 {strides = array<i32>} : memref<128x1xf32, #tpu.memory_space<vmem>>, vector<128x1xf32>,
    %c0_22 = arith.constant 0 : index
    %c0_23 = arith.constant 0 : index
    %50 = vector.load %arg6[%c0_22, %c0_23] : memref<128x1xf32, #tpu.memory_space<vmem>>, vector<128x1xf32>
    tpu.vector_store %arg6[%c0_22, %c0_23], %37 {strides = array<i32>} : memref<128x1xf32, #tpu.memory_space<vmem>>, vector<128x1xf32>,
    %cst_24 = arith.constant dense<0xFF800000> : vector<128xf32>
    %51 = vector.multi_reduction <maximumf>, %30, %cst_24 [0] : vector<128x128xf32> to vector<128xf32>
    %52 = vector.shape_cast %51 : vector<128xf32> to vector<1x128xf32>
    %53 = arith.index_cast %arg1 : i32 to index
    %c0_25 = arith.constant 0 : index
    %c0_26 = arith.constant 0 : index
    %54 = vector.load %arg10[%53, %c0_25, %c0_26] : memref<2x1x128xf32, #tpu.memory_space<vmem>>, vector<1x1x128xf32>
    %55 = vector.shape_cast %54 : vector<1x1x128xf32> to vector<1x128xf32>
    %56 = arith.maximumf %55, %52 : vector<1x128xf32>
    %57 = arith.subf %55, %56 : vector<1x128xf32>
    %58 = math.exp %57 : vector<1x128xf32>
    %59 = arith.index_cast %arg1 : i32 to index
    %c0_27 = arith.constant 0 : index
    %c0_28 = arith.constant 0 : index
    %60 = vector.load %arg11[%59, %c0_27, %c0_28] : memref<2x1x128xf32, #tpu.memory_space<vmem>>, vector<1x1x128xf32>
    %61 = vector.shape_cast %60 : vector<1x1x128xf32> to vector<1x128xf32>
    %62 = arith.mulf %58, %61 : vector<1x128xf32>
    %63 = vector.broadcast %56 : vector<1x128xf32> to vector<128x128xf32>
    %64 = arith.subf %30, %63 : vector<128x128xf32>
    %65 = math.exp %64 : vector<128x128xf32>
    %cst_29 = arith.constant dense<0.000000e+00> : vector<128xf32>
    %66 = vector.multi_reduction <add>, %65, %cst_29 [0] : vector<128x128xf32> to vector<128xf32>
    %67 = vector.shape_cast %66 : vector<128xf32> to vector<1x128xf32>
    %68 = arith.addf %62, %67 : vector<1x128xf32>
    %69 = arith.index_cast %arg1 : i32 to index
    %c0_30 = arith.constant 0 : index
    %c0_31 = arith.constant 0 : index
    %70 = vector.load %arg11[%69, %c0_30, %c0_31] : memref<2x1x128xf32, #tpu.memory_space<vmem>>, vector<1x1x128xf32>
    %71 = vector.shape_cast %70 : vector<1x1x128xf32> to vector<1x128xf32>
    %72 = vector.shape_cast %68 : vector<1x128xf32> to vector<1x1x128xf32>
    tpu.vector_store %arg11[%69, %c0_30, %c0_31], %72 {strides = array<i32>} : memref<2x1x128xf32, #tpu.memory_space<vmem>>, vector<1x1x128xf32>,
    %73 = arith.index_cast %arg1 : i32 to index
    %c0_32 = arith.constant 0 : index
    %c0_33 = arith.constant 0 : index
    %74 = vector.load %arg10[%73, %c0_32, %c0_33] : memref<2x1x128xf32, #tpu.memory_space<vmem>>, vector<1x1x128xf32>
    %75 = vector.shape_cast %74 : vector<1x1x128xf32> to vector<1x128xf32>
    %76 = vector.shape_cast %56 : vector<1x128xf32> to vector<1x1x128xf32>
    tpu.vector_store %arg10[%73, %c0_32, %c0_33], %76 {strides = array<i32>} : memref<2x1x128xf32, #tpu.memory_space<vmem>>, vector<1x1x128xf32>,
    %c1_i32 = arith.constant 1 : i32
    %77 = arith.cmpi eq, %arg1, %c1_i32 : i32
    %78 = arith.extui %77 : i1 to i32
    %c0_i32_34 = arith.constant 0 : i32
    %79 = arith.cmpi ne, %78, %c0_i32_34 : i32
    scf.if %79 {
      %c0_40 = arith.constant 0 : index
      %c0_41 = arith.constant 0 : index
      %88 = vector.load %arg7[%c0_40, %c0_41] : memref<128x1xf32, #tpu.memory_space<vmem>>, vector<128x1xf32>
      %89 = math.log %88 : vector<128x1xf32>
      %c0_42 = arith.constant 0 : index
      %c0_43 = arith.constant 0 : index
      %90 = vector.load %arg6[%c0_42, %c0_43] : memref<128x1xf32, #tpu.memory_space<vmem>>, vector<128x1xf32>
      %91 = arith.addf %89, %90 : vector<128x1xf32>
      %c0_44 = arith.constant 0 : index
      %c0_45 = arith.constant 0 : index
      %92 = vector.load %arg8[%c0_44, %c0_45] : memref<128x1xf32, #tpu.memory_space<vmem>>, vector<128x1xf32>
      %93 = arith.subf %91, %92 : vector<128x1xf32>
      %94 = tpu.iota {dimensions = array<i32: 0>} : vector<128x1xi32>
      %c128_i32_46 = arith.constant 128 : i32
      %95 = arith.muli %arg0, %c128_i32_46 : i32
      %96 = vector.broadcast %95 : i32 to vector<128x1xi32>
      %97 = arith.addi %94, %96 : vector<128x1xi32>
      %c200_i32_47 = arith.constant 200 : i32
      %98 = vector.broadcast %c200_i32_47 : i32 to vector<128x1xi32>
      %99 = arith.cmpi slt, %97, %98 : vector<128x1xi32>
      %cst_48 = arith.constant 0.000000e+00 : f32
      %100 = vector.broadcast %cst_48 : f32 to vector<128x1xf32>
      %101 = arith.select %99, %93, %100 : vector<128x1xi1>, vector<128x1xf32>
      %c0_49 = arith.constant 0 : index
      %c0_50 = arith.constant 0 : index
      %102 = vector.load %arg9[%c0_49, %c0_50] : memref<128x1xf32, #tpu.memory_space<vmem>>, vector<128x1xf32>
      %103 = arith.addf %102, %101 : vector<128x1xf32>
      %c0_51 = arith.constant 0 : index
      %c0_52 = arith.constant 0 : index
      %104 = vector.load %arg9[%c0_51, %c0_52] : memref<128x1xf32, #tpu.memory_space<vmem>>, vector<128x1xf32>
      tpu.vector_store %arg9[%c0_51, %c0_52], %103 {strides = array<i32>} : memref<128x1xf32, #tpu.memory_space<vmem>>, vector<128x1xf32>,
    } else {
    }
    %c1_i32_35 = arith.constant 1 : i32
    %80 = arith.cmpi eq, %arg0, %c1_i32_35 : i32
    %81 = arith.extui %80 : i1 to i32
    %c0_i32_36 = arith.constant 0 : i32
    %82 = arith.cmpi ne, %81, %c0_i32_36 : i32
    scf.if %82 {
      %88 = arith.index_cast %arg1 : i32 to index
      %c0_40 = arith.constant 0 : index
      %c0_41 = arith.constant 0 : index
      %89 = vector.load %arg11[%88, %c0_40, %c0_41] : memref<2x1x128xf32, #tpu.memory_space<vmem>>, vector<1x1x128xf32>
      %90 = vector.shape_cast %89 : vector<1x1x128xf32> to vector<1x128xf32>
      %91 = math.log %90 : vector<1x128xf32>
      %92 = arith.index_cast %arg1 : i32 to index
      %c0_42 = arith.constant 0 : index
      %c0_43 = arith.constant 0 : index
      %93 = vector.load %arg10[%92, %c0_42, %c0_43] : memref<2x1x128xf32, #tpu.memory_space<vmem>>, vector<1x1x128xf32>
      %94 = vector.shape_cast %93 : vector<1x1x128xf32> to vector<1x128xf32>
      %95 = arith.addf %91, %94 : vector<1x128xf32>
      %96 = arith.index_cast %arg1 : i32 to index
      %c0_44 = arith.constant 0 : index
      %c0_45 = arith.constant 0 : index
      %97 = vector.load %arg12[%96, %c0_44, %c0_45] : memref<2x1x128xf32, #tpu.memory_space<vmem>>, vector<1x1x128xf32>
      %98 = vector.shape_cast %97 : vector<1x1x128xf32> to vector<1x128xf32>
      %99 = arith.subf %95, %98 : vector<1x128xf32>
      %100 = tpu.iota {dimensions = array<i32: 1>} : vector<1x128xi32>
      %101 = vector.broadcast %9 : i32 to vector<1x128xi32>
      %102 = arith.addi %100, %101 : vector<1x128xi32>
      %c200_i32_46 = arith.constant 200 : i32
      %103 = vector.broadcast %c200_i32_46 : i32 to vector<1x128xi32>
      %104 = arith.cmpi slt, %102, %103 : vector<1x128xi32>
      %cst_47 = arith.constant 0.000000e+00 : f32
      %105 = vector.broadcast %cst_47 : f32 to vector<1x128xf32>
      %106 = arith.select %104, %99, %105 : vector<1x128xi1>, vector<1x128xf32>
      %c0_48 = arith.constant 0 : index
      %c0_49 = arith.constant 0 : index
      %107 = vector.load %arg13[%c0_48, %c0_49] : memref<1x128xf32, #tpu.memory_space<vmem>>, vector<1x128xf32>
      %108 = arith.addf %107, %106 : vector<1x128xf32>
      %c0_50 = arith.constant 0 : index
      %c0_51 = arith.constant 0 : index
      %109 = vector.load %arg13[%c0_50, %c0_51] : memref<1x128xf32, #tpu.memory_space<vmem>>, vector<1x128xf32>
      tpu.vector_store %arg13[%c0_50, %c0_51], %108 {strides = array<i32>} : memref<1x128xf32, #tpu.memory_space<vmem>>, vector<1x128xf32>,
    } else {
    }
    %c1_i32_37 = arith.constant 1 : i32
    %83 = arith.cmpi eq, %arg0, %c1_i32_37 : i32
    %c1_i32_38 = arith.constant 1 : i32
    %84 = arith.cmpi eq, %arg1, %c1_i32_38 : i32
    %85 = arith.andi %83, %84 : i1
    %86 = arith.extui %85 : i1 to i32
    %c0_i32_39 = arith.constant 0 : i32
    %87 = arith.cmpi ne, %86, %c0_i32_39 : i32
    scf.if %87 {
      %c0_40 = arith.constant 0 : index
      %c0_41 = arith.constant 0 : index
      %88 = vector.load %arg9[%c0_40, %c0_41] : memref<128x1xf32, #tpu.memory_space<vmem>>, vector<128x1xf32>
      %89 = vector.shape_cast %88 : vector<128x1xf32> to vector<1x128x1xf32>
      %cst_42 = arith.constant dense<0.000000e+00> : vector<1xf32>
      %90 = vector.multi_reduction <add>, %89, %cst_42 [1, 2] : vector<1x128x1xf32> to vector<1xf32>
      %91 = vector.shape_cast %90 : vector<1xf32> to vector<1x1x1xf32>
      %92 = vector.extract %91[0, 0, 0] : f32 from vector<1x1x1xf32>
      %c0_43 = arith.constant 0 : index
      %c0_44 = arith.constant 0 : index
      %93 = vector.load %arg13[%c0_43, %c0_44] : memref<1x128xf32, #tpu.memory_space<vmem>>, vector<1x128xf32>
      %94 = vector.shape_cast %93 : vector<1x128xf32> to vector<1x1x128xf32>
      %cst_45 = arith.constant dense<0.000000e+00> : vector<1xf32>
      %95 = vector.multi_reduction <add>, %94, %cst_45 [1, 2] : vector<1x1x128xf32> to vector<1xf32>
      %96 = vector.shape_cast %95 : vector<1xf32> to vector<1x1x1xf32>
      %97 = vector.extract %96[0, 0, 0] : f32 from vector<1x1x1xf32>
      %98 = arith.addf %92, %97 : f32
      %cst_46 = arith.constant 4.000000e+02 : f32
      %99 = arith.divf %98, %cst_46 : f32
      %c0_47 = arith.constant 0 : index
      %c0_48 = arith.constant 0 : index
      %100 = memref.load %arg5[%c0_47, %c0_48] : memref<1x1xf32, #tpu.memory_space<smem>>
      memref.store %99, %arg5[%c0_47, %c0_48] : memref<1x1xf32, #tpu.memory_space<smem>>
    } else {
    }
    return
  }
  func.func @transform_0(%arg0: i32, %arg1: i32) -> (i32, i32) {
    %c0_i32 = arith.constant 0 : i32
    %c0_i32_0 = arith.constant 0 : i32
    %c0_i32_1 = arith.constant 0 : i32
    return %c0_i32, %c0_i32_0 : i32, i32
  }
  func.func @transform_1(%arg0: i32, %arg1: i32) -> (i32, i32) {
    %c0_i32 = arith.constant 0 : i32
    %c0_i32_0 = arith.constant 0 : i32
    return %arg0, %c0_i32 : i32, i32
  }
  func.func @transform_2(%arg0: i32, %arg1: i32) -> (i32, i32) {
    %c0_i32 = arith.constant 0 : i32
    %c0_i32_0 = arith.constant 0 : i32
    %c0_i32_1 = arith.constant 0 : i32
    return %c0_i32, %c0_i32_0 : i32, i32
  }
  func.func @transform_3(%arg0: i32, %arg1: i32) -> (i32, i32) {
    %c0_i32 = arith.constant 0 : i32
    %c0_i32_0 = arith.constant 0 : i32
    %c0_i32_1 = arith.constant 0 : i32
    return %c0_i32, %c0_i32_0 : i32, i32
  }
}

</mosaic_0001>

<bundles_post_ra>
// kernel: tpu_custom_call.1
= control target key start
LH: loop header
LB: loop body
LE: loop exit
PB: predicated region body
PF: predicated region fallthrough
CT: control target
= control target key end

     0   :  { %s3115_s0 = inlined_call_operand.<no memory space> [shape: f32[1,1], index: 0, kind: input, shape index: {}]   ;;  %s3116_s1 = inlined_call_operand.hbm [shape: f32[256,128], index: 1, kind: input, shape index: {}]   ;;  %s3117_s2 = inlined_call_operand.hbm [shape: f32[256,128], index: 2, kind: input, shape index: {}]   ;;  %s3118_s3 = inlined_call_operand.hbm [shape: f32[1,1], index: 3, kind: output, shape index: {}]  }
   0x1   :  { %8 = sst [smem:[#allocation10]] %s3115_s0 }
   0x2   :  { %9 = vsyncpa [#allocation12], 0 }
   0x3   :  { %11 = vsyncpa [#allocation12 + $0x1], 0 }
   0x4   :  { %12 = vsyncpa [#allocation15], 0 }
   0x5   :  { %13 = vsyncpa [#allocation13], 0  ;;  %s2054_s14 = smov 0   ;;  %s2056_s15 = smov 0  }
   0x6   :  { %s2058_s16 = smov 0   ;;  %s2060_s17 = smov 0  }
   0x7   :  { %s2062_s18 = smov 0   ;;  %s2064_s19 = smov 0  }
   0x8   :  { %s2066_s20 = smov 0   ;;  %s2068_s21 = smov 0  }
   0x9 LB: > { %s1484_s0 = sadd.s32 4294967295, %s2019_s21   ;;  %p72_p0 = scmp.ne.s32.totalorder %s1995_s15, %s1991_s14  ;;  %s2019_s21 = sphi %s2068_s21, %s19_s21   ;;  %s2015_s20 = sphi %s2066_s20, %s3249_s20   ;;  %s2011_s19 = sphi %s2064_s19, %s3248_s19   ;;  %s2007_s18 = sphi %s2062_s18, %s3247_s18   ;;  %s2003_s17 = sphi %s2060_s17, %s3246_s17   ;;  %s1999_s16 = sphi %s2058_s16, %s3245_s16   ;;  %s1995_s15 = sphi %s2056_s15, %s3244_s15   ;;  %s1991_s14 = sphi %s2054_s14, %s3243_s14  }
   0xa   : > { %p2096_p1 = scmp.eq.s32.totalorder %s1484_s0, 0  ;;  %p1485_p2 = scmp.ge.s32.totalorder %s2019_s21, 1 }
   0xb   : > { %p125_p3 = scmp.lt.s32.totalorder %s2019_s21, 5  ;;  %s2021_s25 = smov [#allocation14]  }
   0xc   : > { %s3151_s22 = scalar_select %p2096_p1, 1, 0 }
   0xd   : > { %p2104_p4 = por %p2096_p1, %p72_p0  ;;  %p2108_p5 = pnand %p1485_p2, %p125_p3 }
   0xe   : > { %s140_s26 = sshll.u32 %s2021_s25, 4  ;;  %s1875_s30 = scalar_lea.hbm %s3117_s2, 4096  ;;  %s141_s26 = int_to_ptr.vmem [resolvable:$true] %s140_s26 }
   0xf   : > { %s3152_s23 = scalar_select %p2104_p4, 1, 0 }
  0x10   : > { %s3153_s24 = scalar_select %p2108_p5, 1, 0 }
  0x11   : > { %p1655_p6 = pneg %p2108_p5  ;;  %p1876_p8 = scmp.ne.s32.totalorder %s3117_s2, %s1875_s30 }
  0x12   : > { %p1882_p12 = scmp.lt.u32.totalorder %s1875_s30, %s3117_s2 }
  0x13   : > { %p2116_p7 = pnand %p1655_p6, %p2096_p1 }
  0x15   : > { %p1877_p9 = pneg %p2116_p7 }
  0x17   : > { %p1878_p10 = pnand %p1877_p9, %p1876_p8 }
  0x19   : > { %p1879_p11 = pneg %p1878_p10 }
  0x1b   : > { %p1884_p13 = pnand %p1882_p12, %p1879_p11 }
  0x1d   : > { %1887 = shalt.err (!%p1884_p13)
}
  0x1e   : > { %s1888_s8 = scalar_lea.vmem %s141_s26, 4096  ;;  %p1896_p6 = scmp.lt.s32.totalorder %s141_s26, %s141_s26 }
  0x1f   : > { %p1889_p0 = scmp.ne.s32.totalorder %s141_s26, %s1888_s8  ;;  %p1897_p1 = scmp.lt.s32.totalorder %s1888_s8, %s1888_s8 }
  0x21   : > { %p1891_p2 = pnand %p1889_p0, %p1877_p9  ;;  %p1898_p4 = por %p1897_p1, %p1896_p6 }
  0x23   : > { %p1892_p3 = pneg %p1891_p2 }
  0x25   : > { %p1899_p5 = pnand %p1898_p4, %p1892_p3 }
  0x27   : > { %1902 = shalt.err (!%p1899_p5)
}
  0x28   : > { %s2022_s9 = smov 128   ;;  %s2023_s10 = smov 8  }
  0x29   : > { %1658 = dma.hbm_to_vmem [thread:$0]  (!%p2116_p7), %s3117_s2, 4096, %s141_s26, [#allocation15], %s2022_s9, %s2022_s9, %s2023_s10  }
  0x2a   : > { %s28_s13 = sadd.s32 1, %s2011_s19  ;;  %s31_s14 = sadd.s32 1, %s2015_s20 }
  0x2b   : > { %p29_p1 = scmp.ge.s32.totalorder %s28_s13, 2  ;;  %s59_s25 = sadd.s32 1, %s1999_s16 }
  0x2c   : > { %p66_p4 = scmp.ne.s32.totalorder %s1999_s16, %s1995_s15  ;;  %p67_p5 = scmp.eq.s32.totalorder %s2019_s21, 0 }
  0x2d   : > { %s3251_s13 = smov (%p29_p1, %s28_s13), 0  ;;  %s3253_s14 = smov (!%p29_p1, %s31_s14), %s2015_s20 }
  0x2e   : > { %p1664_p8 = scmp.lt.s32.totalorder %s2019_s21, 4  ;;  %p33_p9 = scmp.ge.s32.totalorder %s3253_s14, 2 }
  0x2f   : > { %s154_s27 = sand.u32 1, %s1999_s16   ;;  %p68_p10 = por %p67_p5, %p66_p4 }
  0x30   : > { %s3255_s14 = smov (%p33_p9, %s3253_s14), 0  ;;  %s1488_s28 = sshll.u32 %s154_s27, 7 }
  0x31   : > { %s1504_s26 = sshll.u32 %s2015_s20, 11  ;;  %s56_s29 = ssub.s32 %s2015_s20, %s3255_s14 }
  0x32   : > { %p57_p7 = scmp.eq.s32.totalorder %s56_s29, 0  ;;  %s2158_s5 = scalar_lea.hbm %s3116_s1, %s1504_s26 }
  0x33   : > { %s158_s6 = scalar_lea.vmem [#allocation11], %s1488_s28  ;;  %p2160_p11 = pnand %p1664_p8, %p68_p10 }
  0x34   : > { %s165_s7 = sshll.u32 %s158_s6, 4  ;;  %s2169_s12 = scalar_lea.sflag [#allocation12], %s154_s27  ;;  %s2167_s7 = int_to_ptr.vmem [resolvable:$true] %s165_s7 }
  0x35   : > { %s2165_s11 = scalar_select %p57_p7, %s1999_s16, %s59_s25  }
  0x36   : > { %s1903_s26 = scalar_lea.hbm %s2158_s5, 2048  ;;  %p1905_p13 = pneg %p2160_p11 }
  0x37   : > { %p1904_p12 = scmp.ne.s32.totalorder %s2158_s5, %s1903_s26  ;;  %s1908_s30 = scalar_lea.hbm %s3116_s1, 4096 }
  0x38   : > { %p1909_p3 = scmp.lt.u32.totalorder %s2158_s5, %s3116_s1  ;;  %p1910_p6 = scmp.lt.u32.totalorder %s1908_s30, %s1903_s26 }
  0x39   : > { %p1906_p0 = pnand %p1905_p13, %p1904_p12  ;;  %p1912_p4 = scmp.lt.u32.totalorder %s1903_s26, %s2158_s5 }
  0x3a   : > { %p1911_p1 = por %p1910_p6, %p1909_p3 }
  0x3b   : > { %p1907_p2 = pneg %p1906_p0 }
  0x3c   : > { %p1913_p5 = por %p1912_p4, %p1911_p1 }
  0x3e   : > { %p1914_p8 = pnand %p1913_p5, %p1907_p2 }
  0x40   : > { %1917 = shalt.err (!%p1914_p8)
}
  0x41   : > { %s1918_s25 = scalar_lea.vmem %s2167_s7, 2048  ;;  %s2024_s27 = smov [#allocation11]  }
  0x42   : > { %p1919_p9 = scmp.ne.s32.totalorder %s2167_s7, %s1918_s25  ;;  %s1923_s28 = sshll.u32 %s2024_s27, 4  ;;  %s1924_s28 = int_to_ptr.vmem [resolvable:$false] %s1923_s28 }
  0x43   : > { %s1925_s29 = scalar_lea.vmem %s1924_s28, 4096  ;;  %p1926_p12 = scmp.lt.s32.totalorder %s2167_s7, %s1924_s28 }
  0x44   : > { %p1921_p10 = pnand %p1919_p9, %p1905_p13  ;;  %p1927_p0 = scmp.lt.s32.totalorder %s1925_s29, %s1918_s25 }
  0x46   : > { %p1922_p7 = pneg %p1921_p10  ;;  %p1928_p3 = por %p1927_p0, %p1926_p12 }
  0x48   : > { %p1929_p6 = pnand %p1928_p3, %p1922_p7 }
  0x4a   : > { %1932 = shalt.err (!%p1929_p6)
}
  0x4b   : > { %1662 = dma.hbm_to_vmem [thread:$0]  (!%p2160_p11), %s2158_s5, 2048, %s2167_s7, %s2169_s12, %s2022_s9, %s2022_s9, %s2023_s10  }
  0x4c   : > { %p3156_p13 = scmp.ne.s32.totalorder %s3153_s24, 0 }
  0x4e   : > { %177 = sbr.rel (%p3156_p13) target bundleno = 1381 (0x565), region = 32 }
  0x55   : > { %s179_s26 = sand.u32 1, %s1995_s15   ;;  %p3157_p2 = scmp.ne.s32.totalorder %s3152_s23, 0 }
  0x56   : > { %s1492_s30 = sshll.u32 %s179_s26, 7  ;;  %s180_s4 = scalar_lea.sflag [#allocation12], %s179_s26 }
  0x57   : > { %s2203_s6 = scalar_lea.vmem [#allocation11], %s1492_s30 }
  0x58   : > { %1978 = dma.done.wait (%p3157_p2), %s180_s4, 2048  }
  0x59   : > { %1980 = vsyncadd (%p3157_p2), %s180_s4, 4294965248  ;;  %p3158_p1 = scmp.ne.s32.totalorder %s3151_s22, 0 }
  0x5b   : > { %1982 = dma.done.wait (%p3158_p1), [#allocation15], 4096  }
  0x5c   : > { %1984 = vsyncadd (%p3158_p1), [#allocation15], 4294963200  ;;  %p206_p11 = scmp.eq.s32.totalorder %s2007_s18, 0  ;;  %p207_p4 = scmp.eq.s32.totalorder %s2003_s17, 0 }
  0x5e   : > { %p208_p5 = pnand %p207_p4, %p206_p11 }
  0x5f   : > { %vm212_vm0 = vcmask (!%p208_p5), 7168   ;;  %v2025_v0 = vmov (!%p208_p5), 0.0   ;;  %v2026_v1 = vmov (!%p208_p5), -1e+30  }
  0x60   : > { %211 = sbr.rel (%p208_p5) target bundleno = 108 (0x6c), region = 44  ;;  %213 = vst.msk [vmem:[#allocation5] sm:$0xff] (!%p208_p5), %vm212_vm0, %v2025_v0  ;;  %214 = vst.msk [vmem:[#allocation5 + $0x8] sm:$0xff] (!%p208_p5), %vm212_vm0, %v2025_v0 }
  0x61   : > { %215 = vst.msk [vmem:[#allocation5 + $0x10] sm:$0xff] (!%p208_p5), %vm212_vm0, %v2025_v0  ;;  %216 = vst.msk [vmem:[#allocation5 + $0x18] sm:$0xff] (!%p208_p5), %vm212_vm0, %v2025_v0 }
  0x62   : > { %217 = vst.msk [vmem:[#allocation5 + $0x20] sm:$0xff] (!%p208_p5), %vm212_vm0, %v2025_v0  ;;  %218 = vst.msk [vmem:[#allocation5 + $0x28] sm:$0xff] (!%p208_p5), %vm212_vm0, %v2025_v0 }
  0x63   : > { %219 = vst.msk [vmem:[#allocation5 + $0x30] sm:$0xff] (!%p208_p5), %vm212_vm0, %v2025_v0  ;;  %220 = vst.msk [vmem:[#allocation5 + $0x38] sm:$0xff] (!%p208_p5), %vm212_vm0, %v2025_v0 }
  0x64   : > { %221 = vst.msk [vmem:[#allocation5 + $0x40] sm:$0xff] (!%p208_p5), %vm212_vm0, %v2025_v0  ;;  %222 = vst.msk [vmem:[#allocation5 + $0x48] sm:$0xff] (!%p208_p5), %vm212_vm0, %v2025_v0 }
  0x65   : > { %223 = vst.msk [vmem:[#allocation5 + $0x50] sm:$0xff] (!%p208_p5), %vm212_vm0, %v2025_v0  ;;  %224 = vst.msk [vmem:[#allocation5 + $0x58] sm:$0xff] (!%p208_p5), %vm212_vm0, %v2025_v0 }
  0x66   : > { %225 = vst.msk [vmem:[#allocation5 + $0x60] sm:$0xff] (!%p208_p5), %vm212_vm0, %v2025_v0  ;;  %226 = vst.msk [vmem:[#allocation5 + $0x68] sm:$0xff] (!%p208_p5), %vm212_vm0, %v2025_v0 }
  0x67   : > { %227 = vst.msk [vmem:[#allocation5 + $0x70] sm:$0xff] %vm212_vm0, %v2025_v0  ;;  %228 = vst.msk [vmem:[#allocation5 + $0x78] sm:$0xff] %vm212_vm0, %v2025_v0 }
  0x68   : > { %229 = vst [vmem:[#allocation9] sm:$0x1] %v2025_v0  ;;  %232 = vst [vmem:[#allocation7] sm:$0x1] %v2025_v0 }
  0x69   : > { %233 = vst [vmem:[#allocation7 + $0x1] sm:$0x1] %v2025_v0  ;;  %234 = vst [vmem:[#allocation8] sm:$0x1] %v2025_v0 }
  0x6a   : > { %235 = vst [vmem:[#allocation8 + $0x1] sm:$0x1] %v2025_v0  ;;  %230 = vst [vmem:[#allocation6] sm:$0x1] %v2026_v1 }
  0x6b   : > { %231 = vst [vmem:[#allocation6 + $0x1] sm:$0x1] %v2026_v1 }
  0x6c PF: > { %p1494_p8 = scmp.ne.s32.totalorder %s2003_s17, 0 }
  0x6d   : > { %vm239_vm1 = vcmask (!%p1494_p8), 7168   ;;  %v2027_v2 = vmov (!%p1494_p8), -1e+30   ;;  %v2028_v3 = vmov (!%p1494_p8), 0.0  }
  0x6e   : > { %238 = sbr.rel (%p1494_p8) target bundleno = 126 (0x7e), region = 48  ;;  %240 = vst.msk [vmem:[#allocation2] sm:$0xff] (!%p1494_p8), %vm239_vm1, %v2027_v2  ;;  %241 = vst.msk [vmem:[#allocation2 + $0x8] sm:$0xff] (!%p1494_p8), %vm239_vm1, %v2027_v2 }
  0x6f   : > { %242 = vst.msk [vmem:[#allocation2 + $0x10] sm:$0xff] (!%p1494_p8), %vm239_vm1, %v2027_v2  ;;  %243 = vst.msk [vmem:[#allocation2 + $0x18] sm:$0xff] (!%p1494_p8), %vm239_vm1, %v2027_v2 }
  0x70   : > { %244 = vst.msk [vmem:[#allocation2 + $0x20] sm:$0xff] (!%p1494_p8), %vm239_vm1, %v2027_v2  ;;  %245 = vst.msk [vmem:[#allocation2 + $0x28] sm:$0xff] (!%p1494_p8), %vm239_vm1, %v2027_v2 }
  0x71   : > { %246 = vst.msk [vmem:[#allocation2 + $0x30] sm:$0xff] (!%p1494_p8), %vm239_vm1, %v2027_v2  ;;  %247 = vst.msk [vmem:[#allocation2 + $0x38] sm:$0xff] (!%p1494_p8), %vm239_vm1, %v2027_v2 }
  0x72   : > { %248 = vst.msk [vmem:[#allocation2 + $0x40] sm:$0xff] (!%p1494_p8), %vm239_vm1, %v2027_v2  ;;  %249 = vst.msk [vmem:[#allocation2 + $0x48] sm:$0xff] (!%p1494_p8), %vm239_vm1, %v2027_v2 }
  0x73   : > { %250 = vst.msk [vmem:[#allocation2 + $0x50] sm:$0xff] (!%p1494_p8), %vm239_vm1, %v2027_v2  ;;  %251 = vst.msk [vmem:[#allocation2 + $0x58] sm:$0xff] (!%p1494_p8), %vm239_vm1, %v2027_v2 }
  0x74   : > { %252 = vst.msk [vmem:[#allocation2 + $0x60] sm:$0xff] (!%p1494_p8), %vm239_vm1, %v2027_v2  ;;  %253 = vst.msk [vmem:[#allocation2 + $0x68] sm:$0xff] (!%p1494_p8), %vm239_vm1, %v2027_v2 }
  0x75   : > { %254 = vst.msk [vmem:[#allocation2 + $0x70] sm:$0xff] %vm239_vm1, %v2027_v2  ;;  %255 = vst.msk [vmem:[#allocation2 + $0x78] sm:$0xff] %vm239_vm1, %v2027_v2 }
  0x76   : > { %256 = vst.msk [vmem:[#allocation3] sm:$0xff] %vm239_vm1, %v2028_v3  ;;  %257 = vst.msk [vmem:[#allocation3 + $0x8] sm:$0xff] %vm239_vm1, %v2028_v3 }
  0x77   : > { %258 = vst.msk [vmem:[#allocation3 + $0x10] sm:$0xff] %vm239_vm1, %v2028_v3  ;;  %259 = vst.msk [vmem:[#allocation3 + $0x18] sm:$0xff] %vm239_vm1, %v2028_v3 }
  0x78   : > { %260 = vst.msk [vmem:[#allocation3 + $0x20] sm:$0xff] %vm239_vm1, %v2028_v3  ;;  %261 = vst.msk [vmem:[#allocation3 + $0x28] sm:$0xff] %vm239_vm1, %v2028_v3 }
  0x79   : > { %262 = vst.msk [vmem:[#allocation3 + $0x30] sm:$0xff] %vm239_vm1, %v2028_v3  ;;  %263 = vst.msk [vmem:[#allocation3 + $0x38] sm:$0xff] %vm239_vm1, %v2028_v3 }
  0x7a   : > { %264 = vst.msk [vmem:[#allocation3 + $0x40] sm:$0xff] %vm239_vm1, %v2028_v3  ;;  %265 = vst.msk [vmem:[#allocation3 + $0x48] sm:$0xff] %vm239_vm1, %v2028_v3 }
  0x7b   : > { %266 = vst.msk [vmem:[#allocation3 + $0x50] sm:$0xff] %vm239_vm1, %v2028_v3  ;;  %267 = vst.msk [vmem:[#allocation3 + $0x58] sm:$0xff] %vm239_vm1, %v2028_v3 }
  0x7c   : > { %268 = vst.msk [vmem:[#allocation3 + $0x60] sm:$0xff] %vm239_vm1, %v2028_v3  ;;  %269 = vst.msk [vmem:[#allocation3 + $0x68] sm:$0xff] %vm239_vm1, %v2028_v3 }
  0x7d   : > { %270 = vst.msk [vmem:[#allocation3 + $0x70] sm:$0xff] %vm239_vm1, %v2028_v3  ;;  %271 = vst.msk [vmem:[#allocation3 + $0x78] sm:$0xff] %vm239_vm1, %v2028_v3 }
  0x7e PF: > { %s1495_s22 = sshll.u32 %s2003_s17, 7  ;;  %v273_v4 = vld [vmem:[%s2203_s6] sm:$0xff]  ;;  %v274_v30 = vld [vmem:[%s2203_s6 + $0x8] sm:$0xff]  ;;  %v275_v32 = vld [vmem:[%s2203_s6 + $0x10] sm:$0xff]  ;;  %v469_v44 = vlaneseq  ;;  %s1496_s24 = sshll.u32 %s2007_s18, 7 }
  0x7f   : > { %v281_v5 = vld [vmem:[%s2203_s6 + $0x40] sm:$0xff]  ;;  %1569 = vmatprep.mubr.f32.mxu0 %v273_v4  ;;  %s2269_s23 = scalar_lea.vmem [#allocation14], %s1495_s22  ;;  %v282_v31 = vld [vmem:[%s2203_s6 + $0x48] sm:$0xff]  ;;  %v283_v33 = vld [vmem:[%s2203_s6 + $0x50] sm:$0xff]  ;;  %v2307_v47 = vstv %s1496_s24  ;;  %s451_s9 = sld [smem:[#allocation10]] }
  0x80   : > { %1581 = vmatprep.mubr.f32.mxu1 %v281_v5  ;;  %v290_v6 = vld [vmem:[%s2269_s23] sm:$0xff]  ;;  %v291_v7 = vld [vmem:[%s2269_s23 + $0x8] sm:$0xff]  ;;  %v292_v8 = vld [vmem:[%s2269_s23 + $0x10] sm:$0xff]  ;;  %v2301_v45 = vshrl.u32 %v469_v44, 7  ;;  %v2309_v48 = vand.u32 127, %v469_v44  ;;  %v506_v50 = vstv %s1495_s22  ;;  %p1497_p9 = scmp.ne.s32.totalorder %s2007_s18, %s2003_s17 }
  0x81   : > { %v1593_v9 = vpack.c.bf16 %v291_v7, %v290_v6  ;;  %v293_v10 = vld [vmem:[%s2269_s23 + $0x18] sm:$0xff]  ;;  %v294_v12 = vld [vmem:[%s2269_s23 + $0x20] sm:$0xff]  ;;  %v295_v13 = vld [vmem:[%s2269_s23 + $0x28] sm:$0xff]  ;;  %s663_s10 = scalar_lea.vmem (!%p1497_p9), [#allocation8], %s2003_s17 }
  0x82   : > { %v1597_v11 = vpack.c.bf16 %v293_v10, %v292_v8  ;;  %v1601_v14 = vpack.c.bf16 %v295_v13, %v294_v12  ;;  %v296_v15 = vld [vmem:[%s2269_s23 + $0x30] sm:$0xff]  ;;  %v297_v16 = vld [vmem:[%s2269_s23 + $0x38] sm:$0xff]  ;;  %v298_v18 = vld [vmem:[%s2269_s23 + $0x40] sm:$0xff]  ;;  %v2305_v46 = vadd.s32 8, %v2301_v45  ;;  %v2312_v49 = vadd.s32 72, %v2301_v45 }
  0x83   : > { %1594 = vmatprep.subr.bf16.mxu0 %v1593_v9  ;;  %1625 = vmatprep.subr.bf16.mxu1 %v1593_v9  ;;  %v1605_v17 = vpack.c.bf16 %v297_v16, %v296_v15  ;;  %v299_v19 = vld [vmem:[%s2269_s23 + $0x48] sm:$0xff]  ;;  %v300_v21 = vld [vmem:[%s2269_s23 + $0x50] sm:$0xff]  ;;  %v301_v22 = vld [vmem:[%s2269_s23 + $0x58] sm:$0xff]  ;;  %v2321_v52 = vadd.s32 64, %v2301_v45  ;;  %v2324_v53 = vadd.s32 %v506_v50, %v2309_v48  ;;  %v2331_v55 = vadd.s32 24, %v2301_v45 }
  0x84   : > { %1596 = vmatpush3.bf16.xpose.msra.mxu0 %v1593_v9  ;;  %1633 = vmatpush3.bf16.xpose.msra.mxu1 %v1593_v9  ;;  %v1609_v20 = vpack.c.bf16 %v299_v19, %v298_v18  ;;  %v1613_v23 = vpack.c.bf16 %v301_v22, %v300_v21  ;;  %v302_v24 = vld [vmem:[%s2269_s23 + $0x60] sm:$0xff]  ;;  %v303_v25 = vld [vmem:[%s2269_s23 + $0x68] sm:$0xff]  ;;  %v304_v27 = vld [vmem:[%s2269_s23 + $0x70] sm:$0xff]  ;;  %v2318_v51 = vadd.s32 %v2307_v47, %v2305_v46  ;;  %v2334_v56 = vadd.s32 88, %v2301_v45 }
  0x85   : > { %1598 = vmatprep.subr.bf16.mxu0 %v1597_v11  ;;  %1626 = vmatprep.subr.bf16.mxu1 %v1597_v11  ;;  %v1617_v26 = vpack.c.bf16 %v303_v25, %v302_v24  ;;  %v305_v28 = vld [vmem:[%s2269_s23 + $0x78] sm:$0xff]  ;;  %v277_v36 = vld [vmem:[%s2203_s6 + $0x20] sm:$0xff]  ;;  %v278_v38 = vld [vmem:[%s2203_s6 + $0x28] sm:$0xff]  ;;  %3160 = vst [vmem:[#allocation21_spill] sm:$0xff] %v2324_v53  ;;  %v2328_v54 = vadd.s32 %v2307_v47, %v2312_v49  ;;  %v2337_v57 = vadd.s32 16, %v2301_v45  ;;  %v2340_v58 = vadd.s32 80, %v2301_v45 }
  0x86   : > { %v1621_v29 = vpack.c.bf16 %v305_v28, %v304_v27  ;;  %v276_v34 = vld [vmem:[%s2203_s6 + $0x18] sm:$0xff]  ;;  %v285_v37 = vld [vmem:[%s2203_s6 + $0x60] sm:$0xff]  ;;  %v286_v39 = vld [vmem:[%s2203_s6 + $0x68] sm:$0xff]  ;;  %3159 = vst [vmem:[#allocation20_spill] sm:$0xff] %v2318_v51  ;;  %v2344_v59 = vadd.s32 %v2307_v47, %v2301_v45  ;;  %v2347_v60 = vadd.s32 40, %v2301_v45  ;;  %vm509_vm2 = vcmp.lt.s32.totalorder %v2318_v51, 200 }
  0x87   : > { %v284_v35 = vld [vmem:[%s2203_s6 + $0x58] sm:$0xff]  ;;  %v279_v40 = vld [vmem:[%s2203_s6 + $0x30] sm:$0xff]  ;;  %3161 = vst [vmem:[#allocation22_spill] sm:$0xff] %v2328_v54  ;;  %v2352_v61 = vadd.s32 %v2307_v47, %v2321_v52  ;;  %v2355_v62 = vadd.s32 104, %v2301_v45  ;;  %vm524_vm3 = vcmp.lt.s32.totalorder %v2324_v53, 200  ;;  %vm3123_vm4 = vcmp.lt.s32.totalorder %v2328_v54, 200 }
  0x88   : > { %v287_v41 = vld [vmem:[%s2203_s6 + $0x70] sm:$0xff]  ;;  %v280_v42 = vld [vmem:[%s2203_s6 + $0x38] sm:$0xff]  ;;  %3162 = vst [vmem:[#allocation23_spill] sm:$0xff] %v2344_v59  ;;  %v2361_v63 = vadd.s32 %v2307_v47, %v2331_v55  ;;  %v2365_v0 = vadd.s32 %v2307_v47, %v2334_v56  ;;  %v2369_v1 = vadd.s32 %v2307_v47, %v2337_v57  ;;  %v2373_v2 = vadd.s32 %v2307_v47, %v2340_v58  ;;  %vm2392_vm6 = vmand %vm509_vm2, %vm524_vm3 }
  0x89   : > { %v288_v43 = vld [vmem:[%s2203_s6 + $0x78] sm:$0xff]  ;;  %3163 = vst [vmem:[#allocation24_spill] sm:$0xff] %v2352_v61  ;;  %v2376_v3 = vadd.s32 32, %v2301_v45  ;;  %v2379_v4 = vadd.s32 96, %v2301_v45  ;;  %vm508_vm5 = vcmp.lt.s32.totalorder %v2344_v59, 200  ;;  %v2384_v5 = vadd.s32 %v2307_v47, %v2347_v60  ;;  %vm2405_vm8 = vmand %vm3123_vm4, %vm524_vm3 }
  0x8a   : > { %3164 = vst [vmem:[#allocation25_spill] sm:$0xff] %v2361_v63  ;;  %3165 = vst [vmem:[#allocation26_spill] sm:$0xff] %v2365_v0  ;;  %v2386_v6 = vstv %s451_s9  ;;  %vm3126_vm7 = vcmp.lt.s32.totalorder %v2352_v61, 200  ;;  %v2399_v8 = vadd.s32 %v2307_v47, %v2355_v62  ;;  %vm511_vm9 = vcmp.lt.s32.totalorder %v2361_v63, 200 }
  0x8b   : > { %3166 = vst [vmem:[#allocation27_spill] sm:$0xff] %v2369_v1  ;;  %3167 = vst [vmem:[#allocation28_spill] sm:$0xff] %v2373_v2  ;;  %vm3124_vm10 = vcmp.lt.s32.totalorder %v2365_v0, 200  ;;  %v2412_v10 = vadd.s32 56, %v2301_v45  ;;  %vm510_vm12 = vcmp.lt.s32.totalorder %v2369_v1, 200  ;;  %vm3125_vm13 = vcmp.lt.s32.totalorder %v2373_v2, 200 }
  0x8c   : > { %1600 = vmatpush3.bf16.xpose.msra.mxu0 %v1597_v11  ;;  %1634 = vmatpush3.bf16.xpose.msra.mxu1 %v1597_v11  ;;  %3168 = vst [vmem:[#allocation29_spill] sm:$0xff] %v2384_v5  ;;  %3171 = vst [vmem:[#allocation30_spill] sm:$0xff] %v2399_v8  ;;  %v2415_v11 = vadd.s32 120, %v2301_v45  ;;  %v2429_v15 = vadd.s32 %v2307_v47, %v2376_v3  ;;  %v2433_v16 = vadd.s32 %v2307_v47, %v2379_v4 }
  0x8d   : > { %1602 = vmatprep.subr.bf16.mxu0 %v1601_v14  ;;  %1627 = vmatprep.subr.bf16.mxu1 %v1601_v14  ;;  %vm2421_vm11 = vmand %vm508_vm5, %vm524_vm3  ;;  %vm3127_vm15 = vcmp.lt.s32.totalorder %v2384_v5, 200  ;;  %v2443_v21 = vadd.s32 48, %v2301_v45  ;;  %vm3128_vm1 = vcmp.lt.s32.totalorder %v2399_v8, 200  ;;  %v2457_v25 = vadd.s32 112, %v2301_v45 }
  0x8e   : > { %3176 = vst [vmem:[#allocation31_spill] sm:$0xff] %v2429_v15  ;;  %3177 = vst [vmem:[#allocation32_spill] sm:$0xff] %v2433_v16 }
  0x8f   : > { %vm533_vm14 = vmand %vm3126_vm7, %vm524_vm3  ;;  %v2521_v44 = vadd.s32 %v2307_v47, %v2457_v25 }
  0x90   : > { %vm2451_vm0 = vmand %vm511_vm9, %vm524_vm3 }
  0x91   : > { %vm2471_vm4 = vmand %vm3124_vm10, %vm524_vm3  ;;  %vm3129_vm10 = vcmp.lt.s32.totalorder %v2433_v16, 200  ;;  %3189 = vst [vmem:[#allocation36_spill] sm:$0xff] %v2521_v44 }
  0x94   : > { %1604 = vmatpush3.bf16.xpose.msra.mxu0 %v1601_v14  ;;  %1635 = vmatpush3.bf16.xpose.msra.mxu1 %v1601_v14 }
  0x95   : > { %1606 = vmatprep.subr.bf16.mxu0 %v1605_v17  ;;  %1628 = vmatprep.subr.bf16.mxu1 %v1605_v17 }
  0x9c   : > { %1608 = vmatpush3.bf16.xpose.msra.mxu0 %v1605_v17  ;;  %1636 = vmatpush3.bf16.xpose.msra.mxu1 %v1605_v17 }
  0x9d   : > { %1610 = vmatprep.subr.bf16.mxu0 %v1609_v20  ;;  %1629 = vmatprep.subr.bf16.mxu1 %v1609_v20 }
  0xa4   : > { %1612 = vmatpush3.bf16.xpose.msra.mxu0 %v1609_v20  ;;  %1637 = vmatpush3.bf16.xpose.msra.mxu1 %v1609_v20 }
  0xa5   : > { %1614 = vmatprep.subr.bf16.mxu0 %v1613_v23  ;;  %1630 = vmatprep.subr.bf16.mxu1 %v1613_v23 }
  0xac   : > { %1616 = vmatpush3.bf16.xpose.msra.mxu0 %v1613_v23  ;;  %1638 = vmatpush3.bf16.xpose.msra.mxu1 %v1613_v23 }
  0xad   : > { %1618 = vmatprep.subr.bf16.mxu0 %v1617_v26  ;;  %1631 = vmatprep.subr.bf16.mxu1 %v1617_v26 }
  0xb4   : > { %1620 = vmatpush3.bf16.xpose.msra.mxu0 %v1617_v26  ;;  %1639 = vmatpush3.bf16.xpose.msra.mxu1 %v1617_v26 }
  0xb5   : > { %1622 = vmatprep.subr.bf16.mxu0 %v1621_v29  ;;  %1632 = vmatprep.subr.bf16.mxu1 %v1621_v29 }
  0xbc   : > { %1624 = vmatpush3.bf16.xpose.msra.mxu0 %v1621_v29  ;;  %1640 = vmatpush3.bf16.xpose.msra.mxu1 %v1621_v29  ;;  %v2477_v29 = vadd.s32 %v2307_v47, %v2412_v10 }
  0xbe   : > { %3182 = vst [vmem:[#allocation33_spill] sm:$0xff] %v2477_v29  ;;  %vm515_vm7 = vcmp.lt.s32.totalorder %v2477_v29, 200 }
  0xc3   : > { %1570 = vmatmul.mubr.f32.vlgmr.msra.gmra.mrb[0].mxu0 %v274_v30  ;;  %1582 = vmatmul.mubr.f32.vlgmr.msra.gmra.mrb[0].mxu1 %v282_v31  ;;  %v2481_v30 = vadd.s32 %v2307_v47, %v2415_v11 }
  0xc4   : > { %1572 = vmatprep.mubr.f32.mxu0 %v275_v32  ;;  %1584 = vmatprep.mubr.f32.mxu1 %v283_v33 }
  0xc5   : > { %3183 = vst [vmem:[#allocation34_spill] sm:$0xff] %v2481_v30 }
  0xc7   : > { %1573 = vmatmul.mubr.f32.gmra.mrb[2].mxu0 %v276_v34  ;;  %1585 = vmatmul.mubr.f32.gmra.mrb[2].mxu1 %v284_v35 }
  0xc8   : > { %1575 = vmatprep.mubr.f32.mxu0 %v277_v36  ;;  %1587 = vmatprep.mubr.f32.mxu1 %v285_v37 }
  0xcb   : > { %1576 = vmatmul.mubr.f32.gmra.mrb[4].mxu0 %v278_v38  ;;  %1588 = vmatmul.mubr.f32.gmra.mrb[4].mxu1 %v286_v39 }
  0xcc   : > { %1578 = vmatprep.mubr.f32.mxu0 %v279_v40  ;;  %1590 = vmatprep.mubr.f32.mxu1 %v287_v41  ;;  %v2506_v40 = vadd.s32 %v2307_v47, %v2443_v21 }
  0xce   : > { %3186 = vst [vmem:[#allocation35_spill] sm:$0xff] %v2506_v40 }
  0xcf   : > { %1579 = vmatmul.mubr.f32.gmra.mrb[6].mxu0 %v280_v42  ;;  %1591 = vmatmul.mubr.f32.gmra.mrb[6].mxu1 %v288_v43 }
 0x196   : > { %v1571_v12 = vpop.f32.mrb[0].mxu0  ;;  %v1583_v13 = vpop.f32.mrb[0].mxu1 }
 0x197   : > { %v454_v17 = vmul.f32 %v1571_v12, %v2386_v6  ;;  %v462_v18 = vmul.f32 %v1583_v13, %v2386_v6  ;;  %v372_v19 = vpop.f32.mrb[1].mxu0  ;;  %v412_v20 = vpop.f32.mrb[1].mxu1 }
 0x198   : > { %v453_v22 = vmul.f32 %v2386_v6, %v372_v19  ;;  %v461_v23 = vmul.f32 %v2386_v6, %v412_v20 }
 0x199   : > { %v2461_v26 = vsel %vm2392_vm6, %v454_v17, -1e+30  ;;  %v2465_v27 = vsel %vm2405_vm8, %v462_v18, -1e+30  ;;  %vm2493_vm6 = vmand %vm510_vm12, %vm524_vm3 }
 0x19a   : > { %v2485_v31 = vsel %vm2421_vm11, %v453_v22, -1e+30  ;;  %v2487_v32 = vsel %vm533_vm14, %v461_v23, -1e+30  ;;  %v1574_v33 = vpop.f32.mrb[2].mxu0  ;;  %v1586_v34 = vpop.f32.mrb[2].mxu1  ;;  %vm535_vm8 = vmand %vm3125_vm13, %vm524_vm3 }
 0x19b   : > { %v456_v36 = vmul.f32 %v1574_v33, %v2386_v6  ;;  %v464_v37 = vmul.f32 %v1586_v34, %v2386_v6  ;;  %v382_v38 = vpop.f32.mrb[3].mxu0  ;;  %v422_v39 = vpop.f32.mrb[3].mxu1  ;;  %vm512_vm11 = vcmp.lt.s32.totalorder %v2429_v15, 200  ;;  %vm2514_vm14 = vmand %vm3127_vm15, %vm524_vm3  ;;  %vm523_vm15 = vcmp.lt.s32.totalorder %v2481_v30, 200 }
 0x19c   : > { %v455_v41 = vmul.f32 %v2386_v6, %v382_v38  ;;  %v463_v42 = vmul.f32 %v2386_v6, %v422_v39  ;;  %vm2535_vm13 = vmand %vm3128_vm1, %vm524_vm3  ;;  %vm522_vm1 = vcmp.lt.s32.totalorder %v2521_v44, 200 }
 0x19d   : > { %v2525_v50 = vsel %vm2451_vm0, %v456_v36, -1e+30  ;;  %v2529_v7 = vsel %vm2471_vm4, %v464_v37, -1e+30  ;;  %vm529_vm4 = vmand %vm512_vm11, %vm524_vm3 }
 0x19e   : > { %v2543_v47 = vsel %vm2493_vm6, %v455_v41, -1e+30  ;;  %v2545_v12 = vsel %vm535_vm8, %v463_v42, -1e+30  ;;  %v1577_v13 = vpop.f32.mrb[4].mxu0  ;;  %v1589_v14 = vpop.f32.mrb[4].mxu1  ;;  %vm537_vm0 = vmand %vm3129_vm10, %vm524_vm3 }
 0x19f   : > { %v458_v17 = vmul.f32 %v1577_v13, %v2386_v6  ;;  %v466_v18 = vmul.f32 %v1589_v14, %v2386_v6  ;;  %v392_v19 = vpop.f32.mrb[5].mxu0  ;;  %v432_v20 = vpop.f32.mrb[5].mxu1  ;;  %vm514_vm6 = vcmp.lt.s32.totalorder %v2506_v40, 200  ;;  %vm2564_vm8 = vmand %vm515_vm7, %vm524_vm3 }
 0x1a0   : > { %v457_v22 = vmul.f32 %v2386_v6, %v392_v19  ;;  %v465_v23 = vmul.f32 %v2386_v6, %v432_v20  ;;  %vm540_vm10 = vmand %vm523_vm15, %vm524_vm3  ;;  %560 = sbr.rel (%p1497_p9) target bundleno = 592 (0x250), region = 52 }
 0x1a1   : > { %v2571_v28 = vsel %vm2514_vm14, %v458_v17, -1e+30  ;;  %v2575_v33 = vsel %vm2535_vm13, %v466_v18, -1e+30  ;;  %vm531_vm14 = vmand %vm514_vm6, %vm524_vm3 }
 0x1a2   : > { %v2581_v34 = vsel %vm529_vm4, %v457_v22, -1e+30  ;;  %v2583_v35 = vsel %vm537_vm0, %v465_v23, -1e+30  ;;  %v1580_v36 = vpop.f32.mrb[6].mxu0  ;;  %v1592_v37 = vpop.f32.mrb[6].mxu1  ;;  %vm539_vm13 = vmand %vm522_vm1, %vm524_vm3  ;;  %vm563_vm4 = vcmp.eq.s32.totalorder (!%p1497_p9), %v2337_v57, %v2309_v48  ;;  %vm561_vm0 = vcmp.eq.s32.totalorder (!%p1497_p9), %v2301_v45, %v2309_v48 }
 0x1a3   : > { %v460_v38 = vmul.f32 %v1580_v36, %v2386_v6  ;;  %v468_v39 = vmul.f32 %v1592_v37, %v2386_v6  ;;  %v402_v41 = vpop.f32.mrb[7].mxu0  ;;  %v442_v42 = vpop.f32.mrb[7].mxu1  ;;  %v577_v19 = vsel (!%p1497_p9), %vm561_vm0, %v2485_v31, 0.0  ;;  %vm567_vm0 = vcmp.eq.s32.totalorder (!%p1497_p9), %v2443_v21, %v2309_v48 }
 0x1a4   : > { %v459_v43 = vmul.f32 %v2386_v6, %v402_v41  ;;  %v467_v9 = vmul.f32 %v2386_v6, %v442_v42  ;;  %v579_v6 = vsel (!%p1497_p9), %vm563_vm4, %v2543_v47, 0.0  ;;  %593 = vadd.xlane.f32.xlu0 (!%p1497_p9), %v577_v19  ;;  %vm568_vm4 = vcmp.eq.s32.totalorder (!%p1497_p9), %v2412_v10, %v2309_v48 }
 0x1a5   : > { %v2599_v13 = vsel %vm2564_vm8, %v460_v38, -1e+30  ;;  %v2601_v14 = vsel %vm540_vm10, %v468_v39, -1e+30  ;;  %vm564_vm8 = vcmp.eq.s32.totalorder (!%p1497_p9), %v2331_v55, %v2309_v48  ;;  %vm562_vm10 = vcmp.eq.s32.totalorder (!%p1497_p9), %v2305_v46, %v2309_v48  ;;  %597 = vadd.xlane.f32.xlu1 (!%p1497_p9), %v579_v6 }
 0x1a6   : > { %v2603_v17 = vsel %vm531_vm14, %v459_v43, -1e+30  ;;  %v2605_v18 = vsel %vm539_vm13, %v467_v9, -1e+30  ;;  %v578_v20 = vsel (!%p1497_p9), %vm562_vm10, %v2461_v26, 0.0  ;;  %v580_v57 = vsel (!%p1497_p9), %vm564_vm8, %v2525_v50, 0.0 }
 0x1a7   : > { %v642_v22 = vadd.f32 %v578_v20, %v577_v19  ;;  %vm566_vm14 = vcmp.eq.s32.totalorder %v2347_v60, %v2309_v48  ;;  %vm565_vm13 = vcmp.eq.s32.totalorder %v2376_v3, %v2309_v48  ;;  %v584_v37 = vsel %vm568_vm4, %v2599_v13, 0.0 }
 0x1a8   : > { %595 = vadd.xlane.f32.xlu0 %v578_v20  ;;  %v582_v55 = vsel %vm566_vm14, %v2571_v28, 0.0  ;;  %v581_v24 = vsel %vm565_vm13, %v2581_v34, 0.0  ;;  %v583_v3 = vsel %vm567_vm0, %v2603_v17, 0.0  ;;  %vm570_vm8 = vcmp.eq.s32.totalorder %v2312_v49, %v2309_v48 }
 0x1a9   : > { %v643_v23 = vadd.f32 %v642_v22, %v579_v6  ;;  %599 = vadd.xlane.f32.xlu1 %v580_v57  ;;  %vm569_vm10 = vcmp.eq.s32.totalorder %v2321_v52, %v2309_v48  ;;  %v586_v39 = vsel %vm570_vm8, %v2465_v27, 0.0  ;;  %vm572_vm14 = vcmp.eq.s32.totalorder %v2334_v56, %v2309_v48 }
 0x1aa   : > { %v585_v21 = vsel %vm569_vm10, %v2487_v32, 0.0  ;;  %vm571_vm13 = vcmp.eq.s32.totalorder %v2340_v58, %v2309_v48  ;;  %v588_v42 = vsel %vm572_vm14, %v2529_v7, 0.0  ;;  %vm574_vm4 = vcmp.eq.s32.totalorder %v2355_v62, %v2309_v48 }
 0x1ab   : > { %v644_v46 = vadd.f32 %v643_v23, %v580_v57  ;;  %v587_v52 = vsel %vm571_vm13, %v2545_v12, 0.0  ;;  %vm573_vm0 = vcmp.eq.s32.totalorder %v2379_v4, %v2309_v48  ;;  %v590_v9 = vsel %vm574_vm4, %v2575_v33, 0.0 }
 0x1ac   : > { %601 = vadd.xlane.f32.xlu0 %v581_v24  ;;  %v589_v58 = vsel %vm573_vm0, %v2583_v35, 0.0  ;;  %vm576_vm8 = vcmp.eq.s32.totalorder %v2415_v11, %v2309_v48  ;;  %vm575_vm10 = vcmp.eq.s32.totalorder %v2457_v25, %v2309_v48  ;;  %vm625_vm14 = vcmask 7168  }
 0x1ad   : > { %v645_v36 = vadd.f32 %v644_v46, %v581_v24  ;;  %603 = vadd.xlane.f32.xlu1 %v582_v55  ;;  %v592_v4 = vsel %vm576_vm8, %v2601_v14, 0.0  ;;  %v591_v19 = vsel %vm575_vm10, %v2605_v18, 0.0 }
 0x1af   : > { %v646_v60 = vadd.f32 %v645_v36, %v582_v55 }
 0x1b0   : > { %605 = vadd.xlane.f32.xlu0 %v583_v3 }
 0x1b1   : > { %v647_v38 = vadd.f32 %v646_v60, %v583_v3  ;;  %607 = vadd.xlane.f32.xlu1 %v584_v37 }
 0x1b3   : > { %v648_v10 = vadd.f32 %v647_v38, %v584_v37 }
 0x1b4   : > { %609 = vadd.xlane.f32.xlu0 %v585_v21 }
 0x1b5   : > { %v649_v41 = vadd.f32 %v648_v10, %v585_v21  ;;  %611 = vadd.xlane.f32.xlu1 %v586_v39 }
 0x1b7   : > { %v650_v49 = vadd.f32 %v649_v41, %v586_v39 }
 0x1b8   : > { %613 = vadd.xlane.f32.xlu0 %v587_v52 }
 0x1b9   : > { %v651_v43 = vadd.f32 %v650_v49, %v587_v52  ;;  %615 = vadd.xlane.f32.xlu1 %v588_v42 }
 0x1bb   : > { %v652_v56 = vadd.f32 %v651_v43, %v588_v42 }
 0x1bc   : > { %617 = vadd.xlane.f32.xlu0 %v589_v58 }
 0x1bd   : > { %v653_v6 = vadd.f32 %v652_v56, %v589_v58  ;;  %619 = vadd.xlane.f32.xlu1 %v590_v9 }
 0x1bf   : > { %v654_v62 = vadd.f32 %v653_v6, %v590_v9 }
 0x1c0   : > { %621 = vadd.xlane.f32.xlu0 %v591_v19 }
 0x1c1   : > { %v655_v20 = vadd.f32 %v654_v62, %v591_v19  ;;  %623 = vadd.xlane.f32.xlu1 %v592_v4 }
 0x1c3   : > { %v656_v22 = vadd.f32 %v655_v20, %v592_v4 }
 0x1c5   : > { %v657_v57 = vrot.slane %v656_v22, 4 }
 0x1c7   : > { %v658_v23 = vadd.f32 %v657_v57, %v656_v22 }
 0x1c9   : > { %v659_v46 = vrot.slane %v658_v23, 2 }
 0x1cb   : > { %v660_v55 = vadd.f32 %v659_v46, %v658_v23 }
 0x1cd   : > { %v661_v11 = vrot.slane %v660_v55, 1 }
 0x1cf   : > { %v662_v24 = vadd.f32 %v661_v11, %v660_v55 }
 0x1d1   : > { %664 = vst [vmem:[%s663_s10] sm:$0x1] %v662_v24 }
 0x231   : > { %v594_v25 = vpop.xlane.xlu0 %593 }
 0x232   : > { %v598_v48 = vpop.xlane.xlu1 %597  ;;  %626 = vst.msk [vmem:[#allocation4] sm:$0xff] %vm625_vm14, %v594_v25 }
 0x233   : > { %628 = vst.msk [vmem:[#allocation4 + $0x10] sm:$0xff] %vm625_vm14, %v598_v48 }
 0x235   : > { %v596_v60 = vpop.xlane.xlu0 %595 }
 0x236   : > { %v600_v36 = vpop.xlane.xlu1 %599  ;;  %627 = vst.msk [vmem:[#allocation4 + $0x8] sm:$0xff] %vm625_vm14, %v596_v60 }
 0x237   : > { %629 = vst.msk [vmem:[#allocation4 + $0x18] sm:$0xff] %vm625_vm14, %v600_v36 }
 0x239   : > { %v602_v3 = vpop.xlane.xlu0 %601 }
 0x23a   : > { %v604_v37 = vpop.xlane.xlu1 %603  ;;  %630 = vst.msk [vmem:[#allocation4 + $0x20] sm:$0xff] %vm625_vm14, %v602_v3 }
 0x23b   : > { %631 = vst.msk [vmem:[#allocation4 + $0x28] sm:$0xff] %vm625_vm14, %v604_v37 }
 0x23d   : > { %v606_v10 = vpop.xlane.xlu0 %605 }
 0x23e   : > { %v608_v38 = vpop.xlane.xlu1 %607  ;;  %632 = vst.msk [vmem:[#allocation4 + $0x30] sm:$0xff] %vm625_vm14, %v606_v10 }
 0x23f   : > { %633 = vst.msk [vmem:[#allocation4 + $0x38] sm:$0xff] %vm625_vm14, %v608_v38 }
 0x241   : > { %v610_v21 = vpop.xlane.xlu0 %609 }
 0x242   : > { %v612_v39 = vpop.xlane.xlu1 %611  ;;  %634 = vst.msk [vmem:[#allocation4 + $0x40] sm:$0xff] %vm625_vm14, %v610_v21 }
 0x243   : > { %635 = vst.msk [vmem:[#allocation4 + $0x48] sm:$0xff] %vm625_vm14, %v612_v39 }
 0x245   : > { %v614_v49 = vpop.xlane.xlu0 %613 }
 0x246   : > { %v616_v41 = vpop.xlane.xlu1 %615  ;;  %636 = vst.msk [vmem:[#allocation4 + $0x50] sm:$0xff] %vm625_vm14, %v614_v49 }
 0x247   : > { %637 = vst.msk [vmem:[#allocation4 + $0x58] sm:$0xff] %vm625_vm14, %v616_v41 }
 0x249   : > { %v618_v52 = vpop.xlane.xlu0 %617 }
 0x24a   : > { %v620_v42 = vpop.xlane.xlu1 %619  ;;  %638 = vst.msk [vmem:[#allocation4 + $0x60] sm:$0xff] %vm625_vm14, %v618_v52 }
 0x24b   : > { %639 = vst.msk [vmem:[#allocation4 + $0x68] sm:$0xff] %vm625_vm14, %v620_v42 }
 0x24d   : > { %v622_v56 = vpop.xlane.xlu0 %621 }
 0x24e   : > { %v624_v43 = vpop.xlane.xlu1 %623  ;;  %640 = vst.msk [vmem:[#allocation4 + $0x70] sm:$0xff] %vm625_vm14, %v622_v56 }
 0x24f   : > { %641 = vst.msk [vmem:[#allocation4 + $0x78] sm:$0xff] %vm625_vm14, %v624_v43 }
 0x250 PF: > { %669 = vmax.xlane.f32.xlu1 %v2543_v47  ;;  %665 = vmax.xlane.f32.xlu0 %v2485_v31  ;;  %v2029_v9 = vmov 0   ;;  %v2690_v58 = vld [vmem:[#allocation2 + $0x10] sm:$0xff]  ;;  %v2692_v6 = vld [vmem:[#allocation2] sm:$0xff]  ;;  %vm985_vm13 = vcmask 7168   ;;  %v2700_v22 = vld [vmem:[#allocation2 + $0x18] sm:$0xff]  ;;  %v1021_v0 = vmax.f32 %v2525_v50, %v2599_v13  ;;  %s2871_s5 = scalar_lea.vmem [#allocation6], %s2003_s17 }
 0x251   : > { %1741 = vset.pattern.permute.xlu0 %v2029_v9  ;;  %1742 = vset.pattern.permute.xlu1 %v2029_v9  ;;  %v2702_v57 = vld [vmem:[#allocation2 + $0x8] sm:$0xff]  ;;  %v2721_v36 = vld [vmem:[#allocation2 + $0x20] sm:$0xff]  ;;  %v2738_v21 = vld [vmem:[#allocation2 + $0x38] sm:$0xff]  ;;  %s2932_s7 = scalar_lea.vmem [#allocation7], %s2003_s17  ;;  %p1126_p10 = scmp.eq.s32.totalorder %s2003_s17, 1 }
 0x252   : > { %v2719_v25 = vld [vmem:[#allocation2 + $0x28] sm:$0xff]  ;;  %v2740_v41 = vld [vmem:[#allocation2 + $0x30] sm:$0xff]  ;;  %v2798_v37 = vld [vmem:[#allocation2 + $0x60] sm:$0xff]  ;;  %v1025_v29 = vmax.f32 %v1021_v0, %v2529_v7  ;;  %p1498_p7 = scmp.ne.s32.totalorder %s2003_s17, 1 }
 0x253   : > { %v2778_v49 = vld [vmem:[#allocation2 + $0x50] sm:$0xff]  ;;  %v2796_v23 = vld [vmem:[#allocation2 + $0x68] sm:$0xff]  ;;  %v2816_v30 = vld [vmem:[#allocation2 + $0x78] sm:$0xff] }
 0x254   : > { %671 = vmax.xlane.f32.xlu1 %v2525_v50  ;;  %667 = vmax.xlane.f32.xlu0 %v2461_v26  ;;  %3194 = vst [vmem:[#allocation37_spill] sm:$0xff] %v2816_v30  ;;  %v2818_v44 = vld [vmem:[#allocation2 + $0x70] sm:$0xff]  ;;  %v1029_v63 = vmax.f32 %v1025_v29, %v2601_v14  ;;  %v1051_v29 = vsub.s32 0, %v2301_v45 }
 0x255   : > { %3195 = vst [vmem:[#allocation38_spill] sm:$0xff] %v2818_v44 }
 0x258   : > { %675 = vmax.xlane.f32.xlu1 %v2571_v28  ;;  %673 = vmax.xlane.f32.xlu0 %v2581_v34 }
 0x25c   : > { %679 = vmax.xlane.f32.xlu1 %v2599_v13  ;;  %677 = vmax.xlane.f32.xlu0 %v2603_v17 }
 0x260   : > { %683 = vmax.xlane.f32.xlu1 %v2465_v27  ;;  %681 = vmax.xlane.f32.xlu0 %v2487_v32 }
 0x264   : > { %687 = vmax.xlane.f32.xlu1 %v2529_v7  ;;  %685 = vmax.xlane.f32.xlu0 %v2545_v12 }
 0x268   : > { %691 = vmax.xlane.f32.xlu1 %v2575_v33  ;;  %689 = vmax.xlane.f32.xlu0 %v2583_v35 }
 0x26c   : > { %695 = vmax.xlane.f32.xlu1 %v2601_v14  ;;  %693 = vmax.xlane.f32.xlu0 %v2605_v18 }
 0x2dd   : > { %v670_v62 = vpop.xlane.xlu1 %669  ;;  %v666_v4 = vpop.xlane.xlu0 %665 }
 0x2de   : > { %v2695_v19 = vmax.f32 %v2690_v58, %v670_v62  ;;  %v2698_v20 = vmax.f32 %v2692_v6, %v666_v4  ;;  %v2757_v62 = vld [vmem:[#allocation2 + $0x48] sm:$0xff]  ;;  %v2759_v4 = vld [vmem:[#allocation2 + $0x40] sm:$0xff] }
 0x2e0   : > { %1004 = vst.msk [vmem:[#allocation2 + $0x10] sm:$0xff] %vm985_vm13, %v2695_v19  ;;  %1002 = vst.msk [vmem:[#allocation2] sm:$0xff] %vm985_vm13, %v2698_v20  ;;  %811 = vperm.xlu0 %1741, %v2698_v20  }
 0x2e1   : > { %v672_v55 = vpop.xlane.xlu1 %671  ;;  %v668_v11 = vpop.xlane.xlu0 %667 }
 0x2e2   : > { %v2714_v24 = vmax.f32 %v2700_v22, %v672_v55  ;;  %v2717_v48 = vmax.f32 %v2702_v57, %v668_v11  ;;  %v2776_v55 = vld [vmem:[#allocation2 + $0x58] sm:$0xff] }
 0x2e4   : > { %1005 = vst.msk [vmem:[#allocation2 + $0x18] sm:$0xff] %vm985_vm13, %v2714_v24  ;;  %1003 = vst.msk [vmem:[#allocation2 + $0x8] sm:$0xff] %vm985_vm13, %v2717_v48  ;;  %816 = vperm.xlu1 %1742, %v2717_v48  }
 0x2e5   : > { %v676_v3 = vpop.xlane.xlu1 %675  ;;  %v674_v38 = vpop.xlane.xlu0 %673 }
 0x2e6   : > { %v2733_v10 = vmax.f32 %v2719_v25, %v676_v3  ;;  %v2736_v39 = vmax.f32 %v2721_v36, %v674_v38 }
 0x2e8   : > { %1007 = vst.msk [vmem:[#allocation2 + $0x28] sm:$0xff] %vm985_vm13, %v2733_v10  ;;  %821 = vperm.xlu1 %1742, %v2695_v19   ;;  %1006 = vst.msk [vmem:[#allocation2 + $0x20] sm:$0xff] %vm985_vm13, %v2736_v39 }
 0x2e9   : > { %v680_v52 = vpop.xlane.xlu1 %679  ;;  %v678_v43 = vpop.xlane.xlu0 %677 }
 0x2ea   : > { %v2752_v56 = vmax.f32 %v2738_v21, %v680_v52  ;;  %v2755_v9 = vmax.f32 %v2740_v41, %v678_v43 }
 0x2ec   : > { %1009 = vst.msk [vmem:[#allocation2 + $0x38] sm:$0xff] %vm985_vm13, %v2752_v56  ;;  %826 = vperm.xlu1 %1742, %v2714_v24   ;;  %1008 = vst.msk [vmem:[#allocation2 + $0x30] sm:$0xff] %vm985_vm13, %v2755_v9 }
 0x2ed   : > { %v684_v3 = vpop.xlane.xlu1 %683  ;;  %v682_v38 = vpop.xlane.xlu0 %681 }
 0x2ee   : > { %v2771_v52 = vmax.f32 %v2757_v62, %v684_v3  ;;  %v2774_v43 = vmax.f32 %v2759_v4, %v682_v38 }
 0x2f0   : > { %1011 = vst.msk [vmem:[#allocation2 + $0x48] sm:$0xff] %vm985_vm13, %v2771_v52  ;;  %831 = vperm.xlu1 %1742, %v2736_v39   ;;  %856 = vperm.xlu0 %1741, %v2771_v52   ;;  %1010 = vst.msk [vmem:[#allocation2 + $0x40] sm:$0xff] %vm985_vm13, %v2774_v43 }
 0x2f1   : > { %v688_v38 = vpop.xlane.xlu1 %687  ;;  %v686_v11 = vpop.xlane.xlu0 %685 }
 0x2f2   : > { %v2791_v60 = vmax.f32 %v2776_v55, %v688_v38  ;;  %v2794_v42 = vmax.f32 %v2778_v49, %v686_v11 }
 0x2f4   : > { %1013 = vst.msk [vmem:[#allocation2 + $0x58] sm:$0xff] %vm985_vm13, %v2791_v60  ;;  %836 = vperm.xlu1 %1742, %v2733_v10   ;;  %866 = vperm.xlu0 %1741, %v2791_v60   ;;  %1012 = vst.msk [vmem:[#allocation2 + $0x50] sm:$0xff] %vm985_vm13, %v2794_v42 }
 0x2f5   : > { %v692_v11 = vpop.xlane.xlu1 %691  ;;  %v690_v3 = vpop.xlane.xlu0 %689 }
 0x2f6   : > { %v2811_v53 = vmax.f32 %v2796_v23, %v692_v11  ;;  %v2814_v46 = vmax.f32 %v2798_v37, %v690_v3  ;;  %v1020_v11 = vmax.f32 %v2543_v47, %v2603_v17 }
 0x2f8   : > { %1015 = vst.msk [vmem:[#allocation2 + $0x68] sm:$0xff] %vm985_vm13, %v2811_v53  ;;  %841 = vperm.xlu1 %1742, %v2755_v9   ;;  %876 = vperm.xlu0 %1741, %v2811_v53   ;;  %1014 = vst.msk [vmem:[#allocation2 + $0x60] sm:$0xff] %vm985_vm13, %v2814_v46  ;;  %v1024_v61 = vmax.f32 %v1020_v11, %v2545_v12 }
 0x2f9   : > { %v696_v3 = vpop.xlane.xlu1 %695  ;;  %v694_v38 = vpop.xlane.xlu0 %693 }
 0x2fa   : > { %v2831_v16 = vmax.f32 %v2816_v30, %v696_v3  ;;  %v2834_v8 = vmax.f32 %v2818_v44, %v694_v38  ;;  %v1018_v38 = vmax.f32 %v2485_v31, %v2581_v34  ;;  %v1019_v3 = vmax.f32 %v2461_v26, %v2571_v28 }
 0x2fb   : > { %v1028_v15 = vmax.f32 %v1024_v61, %v2605_v18 }
 0x2fc   : > { %3196 = vst [vmem:[#allocation39_spill] sm:$0xff] %v2831_v16  ;;  %3197 = vst [vmem:[#allocation40_spill] sm:$0xff] %v2834_v8  ;;  %846 = vperm.xlu1 %1742, %v2752_v56   ;;  %886 = vperm.xlu0 %1741, %v2831_v16   ;;  %v1022_v2 = vmax.f32 %v1018_v38, %v2487_v32  ;;  %v1023_v54 = vmax.f32 %v1019_v3, %v2465_v27 }
 0x2fd   : > { %1017 = vst.msk [vmem:[#allocation2 + $0x78] sm:$0xff] %vm985_vm13, %v2831_v16  ;;  %1016 = vst.msk [vmem:[#allocation2 + $0x70] sm:$0xff] %vm985_vm13, %v2834_v8  ;;  %v1031_v51 = vmax.f32 %v1028_v15, %v1029_v63 }
 0x2fe   : > { %v1026_v40 = vmax.f32 %v1022_v2, %v2583_v35  ;;  %v1027_v5 = vmax.f32 %v1023_v54, %v2575_v33 }
 0x300   : > { %851 = vperm.xlu1 %1742, %v2774_v43   ;;  %v1030_v1 = vmax.f32 %v1026_v40, %v1027_v5 }
 0x304   : > { %861 = vperm.xlu1 %1742, %v2794_v42  }
 0x308   : > { %871 = vperm.xlu1 %1742, %v2814_v46  }
 0x30c   : > { %881 = vperm.xlu1 %1742, %v2834_v8   ;;  %v1032_v8 = vmax.f32 %v1030_v1, %v1031_v51 }
 0x30e   : > { %v1033_v44 = vrot.slane %v1032_v8, 4 }
 0x310   : > { %v1034_v11 = vmax.f32 %v1032_v8, %v1033_v44  ;;  %v2874_v8 = vld [vmem:[%s2871_s5] sm:$0x1] }
 0x312   : > { %v1035_v2 = vrot.slane %v1034_v11, 2 }
 0x314   : > { %v1036_v61 = vmax.f32 %v1034_v11, %v1035_v2 }
 0x316   : > { %v1037_v63 = vrot.slane %v1036_v61, 1 }
 0x318   : > { %v1038_v1 = vmax.f32 %v1036_v61, %v1037_v63 }
 0x35f   : > { %v812_v59 = vpop.permute.xlu0 %811 }
 0x360   : > { %v889_v38 = vsub.f32 %v2485_v31, %v812_v59 }
 0x362   : > { %v905_v3 = vmul.f32 1.442695, %v889_v38 }
 0x363   : > { %v817_v16 = vpop.permute.xlu1 %816 }
 0x364   : > { %1743 = vpow2.f32 %v905_v3  ;;  %v890_v0 = vsub.f32 %v2461_v26, %v817_v16  ;;  %v2877_v16 = vmax.f32 %v2874_v8, %v1038_v1 }
 0x366   : > { %v907_v54 = vmul.f32 1.442695, %v890_v0  ;;  %v2881_v3 = vrot.slane %v2877_v16, %v1051_v29  ;;  %1125 = vst [vmem:[%s2871_s5] sm:$0x1] %v2877_v16 }
 0x367   : > { %v822_v30 = vpop.permute.xlu1 %821 }
 0x368   : > { %1745 = vpow2.f32 %v907_v54  ;;  %v891_v5 = vsub.f32 %v2543_v47, %v822_v30  ;;  %v1054_v2 = vsub.f32 %v2485_v31, %v2881_v3  ;;  %v1055_v45 = vsub.f32 %v2461_v26, %v2881_v3 }
 0x369   : > { %v1057_v31 = vsub.f32 %v2525_v50, %v2881_v3 }
 0x36a   : > { %v909_v15 = vmul.f32 1.442695, %v891_v5  ;;  %v1072_v1 = vmul.f32 1.442695, %v1055_v45 }
 0x36b   : > { %v827_v51 = vpop.permute.xlu1 %826 }
 0x36c   : > { %1747 = vpow2.f32 %v909_v15  ;;  %v892_v59 = vsub.f32 %v2525_v50, %v827_v51  ;;  %v1056_v15 = vsub.f32 %v2543_v47, %v2881_v3  ;;  %v1070_v51 = vmul.f32 1.442695, %v1054_v2 }
 0x36d   : > { %v1058_v47 = vsub.f32 %v2581_v34, %v2881_v3  ;;  %v1076_v2 = vmul.f32 1.442695, %v1057_v31  ;;  %v1059_v50 = vsub.f32 %v2571_v28, %v2881_v3 }
 0x36e   : > { %v1744_v40 = vpop.eup %1743  ;;  %v911_v30 = vmul.f32 1.442695, %v892_v59 }
 0x36f   : > { %v832_v44 = vpop.permute.xlu1 %831  ;;  %937 = vadd.xlane.f32.xlu1 %v1744_v40  ;;  %v857_v38 = vpop.permute.xlu0 %856 }
 0x370   : > { %1749 = vpow2.f32 %v911_v30  ;;  %v893_v11 = vsub.f32 %v2581_v34, %v832_v44  ;;  %v898_v0 = vsub.f32 %v2465_v27, %v857_v38  ;;  %v1074_v44 = vmul.f32 1.442695, %v1056_v15 }
 0x371   : > { %v1060_v34 = vsub.f32 %v2603_v17, %v2881_v3 }
 0x372   : > { %v1746_v54 = vpop.eup %1745  ;;  %v913_v61 = vmul.f32 1.442695, %v893_v11  ;;  %v923_v29 = vmul.f32 1.442695, %v898_v0 }
 0x373   : > { %v837_v5 = vpop.permute.xlu1 %836  ;;  %939 = vadd.xlane.f32.xlu0 %v1746_v54  ;;  %v867_v63 = vpop.permute.xlu0 %866  ;;  %v1082_v31 = vmul.f32 1.442695, %v1060_v34 }
 0x374   : > { %1751 = vpow2.f32 %v913_v61  ;;  %v894_v59 = vsub.f32 %v2571_v28, %v837_v5  ;;  %v900_v40 = vsub.f32 %v2529_v7, %v867_v63  ;;  %v1078_v63 = vmul.f32 1.442695, %v1058_v47 }
 0x375   : > { %1753 = vpow2.f32 %v1070_v51  ;;  %v1080_v51 = vmul.f32 1.442695, %v1059_v50 }
 0x376   : > { %v1748_v26 = vpop.eup %1747  ;;  %v915_v30 = vmul.f32 1.442695, %v894_v59  ;;  %1755 = vpow2.f32 %v1072_v1  ;;  %v927_v45 = vmul.f32 1.442695, %v900_v40 }
 0x377   : > { %v842_v38 = vpop.permute.xlu1 %841  ;;  %941 = vadd.xlane.f32.xlu0 %v1748_v26  ;;  %v877_v11 = vpop.permute.xlu0 %876 }
 0x378   : > { %1757 = vpow2.f32 %v915_v30  ;;  %v895_v0 = vsub.f32 %v2603_v17, %v842_v38  ;;  %v902_v54 = vsub.f32 %v2575_v33, %v877_v11  ;;  %v1062_v30 = vsub.f32 %v2487_v32, %v2881_v3 }
 0x379   : > { %1759 = vpow2.f32 %v923_v29  ;;  %v1061_v29 = vsub.f32 %v2599_v13, %v2881_v3 }
 0x37a   : > { %v1750_v61 = vpop.eup %1749  ;;  %v917_v5 = vmul.f32 1.442695, %v895_v0  ;;  %1761 = vpow2.f32 %v1074_v44  ;;  %v931_v59 = vmul.f32 1.442695, %v902_v54 }
 0x37b   : > { %v847_v15 = vpop.permute.xlu1 %846  ;;  %943 = vadd.xlane.f32.xlu1 %v1750_v61  ;;  %1763 = vpow2.f32 %v1076_v2  ;;  %v1084_v17 = vmul.f32 1.442695, %v1061_v29  ;;  %v887_v47 = vpop.permute.xlu0 %886  ;;  %v1086_v2 = vmul.f32 1.442695, %v1062_v30 }
 0x37c   : > { %1765 = vpow2.f32 %v917_v5  ;;  %v896_v1 = vsub.f32 %v2599_v13, %v847_v15  ;;  %v1063_v13 = vsub.f32 %v2465_v27, %v2881_v3  ;;  %v1064_v5 = vsub.f32 %v2545_v12, %v2881_v3 }
 0x37d   : > { %1767 = vpow2.f32 %v927_v45  ;;  %v904_v15 = vsub.f32 %v2601_v14, %v887_v47 }
 0x37e   : > { %v1752_v28 = vpop.eup %1751  ;;  %v919_v40 = vmul.f32 1.442695, %v896_v1  ;;  %1769 = vpow2.f32 %v1078_v63  ;;  %v1088_v63 = vmul.f32 1.442695, %v1063_v13  ;;  %v1090_v1 = vmul.f32 1.442695, %v1064_v5 }
 0x37f   : > { %v852_v26 = vpop.permute.xlu1 %851  ;;  %945 = vadd.xlane.f32.xlu0 %v1752_v28  ;;  %1771 = vpow2.f32 %v1080_v51  ;;  %v1754_v44 = vpop.eup %1753  ;;  %v1065_v51 = vsub.f32 %v2529_v7, %v2881_v3 }
 0x380   : > { %1773 = vpow2.f32 %v919_v40  ;;  %v897_v38 = vsub.f32 %v2487_v32, %v852_v26  ;;  %v1756_v11 = vpop.eup %1755  ;;  %v1066_v26 = vsub.f32 %v2583_v35, %v2881_v3 }
 0x381   : > { %1775 = vpow2.f32 %v931_v59  ;;  %v1102_v54 = vadd.f32 %v1756_v11, %v1754_v44  ;;  %v1092_v30 = vmul.f32 1.442695, %v1065_v51  ;;  %v1067_v11 = vsub.f32 %v2575_v33, %v2881_v3 }
 0x382   : > { %v1758_v0 = vpop.eup %1757  ;;  %v921_v45 = vmul.f32 1.442695, %v897_v38  ;;  %1777 = vpow2.f32 %v1082_v31  ;;  %v935_v38 = vmul.f32 1.442695, %v904_v15  ;;  %v1094_v47 = vmul.f32 1.442695, %v1066_v26 }
 0x383   : > { %v1760_v50 = vpop.eup %1759  ;;  %v862_v61 = vpop.permute.xlu1 %861  ;;  %947 = vadd.xlane.f32.xlu1 %v1758_v0  ;;  %1779 = vpow2.f32 %v1084_v17  ;;  %v1096_v5 = vmul.f32 1.442695, %v1067_v11  ;;  %v1069_v33 = vsub.f32 %v2601_v14, %v2881_v3 }
 0x384   : > { %v1762_v32 = vpop.eup %1761  ;;  %1781 = vpow2.f32 %v921_v45  ;;  %v899_v34 = vsub.f32 %v2545_v12, %v862_v61  ;;  %v1068_v61 = vsub.f32 %v2605_v18, %v2881_v3 }
 0x385   : > { %v1764_v27 = vpop.eup %1763  ;;  %1783 = vpow2.f32 %v1086_v2  ;;  %v1103_v59 = vadd.f32 %v1762_v32, %v1102_v54 }
 0x386   : > { %v1766_v29 = vpop.eup %1765  ;;  %v925_v28 = vmul.f32 1.442695, %v899_v34  ;;  %1785 = vpow2.f32 %v1088_v63  ;;  %v1098_v34 = vmul.f32 1.442695, %v1068_v61 }
 0x387   : > { %v1768_v40 = vpop.eup %1767  ;;  %v872_v31 = vpop.permute.xlu1 %871  ;;  %949 = vadd.xlane.f32.xlu0 %v1766_v29  ;;  %1787 = vpow2.f32 %v1090_v1  ;;  %v1104_v17 = vadd.f32 %v1764_v27, %v1103_v59  ;;  %v1100_v29 = vmul.f32 1.442695, %v1069_v33 }
 0x388   : > { %v1770_v12 = vpop.eup %1769  ;;  %1789 = vpow2.f32 %v925_v28  ;;  %v901_v44 = vsub.f32 %v2583_v35, %v872_v31 }
 0x389   : > { %v1772_v7 = vpop.eup %1771  ;;  %v1105_v13 = vadd.f32 %v1770_v12, %v1104_v17  ;;  %1791 = vpow2.f32 %v1092_v30 }
 0x38a   : > { %v1774_v2 = vpop.eup %1773  ;;  %v929_v0 = vmul.f32 1.442695, %v901_v44  ;;  %1793 = vpow2.f32 %v1094_v47  ;;  %v1042_v47 = vsub.f32 %v2874_v8, %v2877_v16  ;;  %v1046_v8 = vld [vmem:[%s2932_s7] sm:$0x1] }
 0x38b   : > { %v1776_v45 = vpop.eup %1775  ;;  %v882_v54 = vpop.permute.xlu1 %881  ;;  %951 = vadd.xlane.f32.xlu1 %v1774_v2  ;;  %v1106_v63 = vadd.f32 %v1772_v7, %v1105_v13 }
 0x38c   : > { %v1778_v35 = vpop.eup %1777  ;;  %1795 = vpow2.f32 %v929_v0  ;;  %v903_v32 = vsub.f32 %v2605_v18, %v882_v54 }
 0x38d   : > { %v1780_v15 = vpop.eup %1779  ;;  %1797 = vpow2.f32 %v935_v38  ;;  %v1107_v27 = vadd.f32 %v1778_v35, %v1106_v63 }
 0x38e   : > { %v1782_v51 = vpop.eup %1781  ;;  %v933_v1 = vmul.f32 1.442695, %v903_v32  ;;  %1799 = vpow2.f32 %v1096_v5 }
 0x38f   : > { %v1784_v59 = vpop.eup %1783  ;;  %953 = vadd.xlane.f32.xlu0 %v1782_v51  ;;  %955 = vadd.xlane.f32.xlu1 %v1760_v50  ;;  %1801 = vpow2.f32 %v1098_v34  ;;  %v1108_v28 = vadd.f32 %v1780_v15, %v1107_v27  ;;  %v3198_v51 = vsub.f32 %v2692_v6, %v2698_v20  ;;  %v3202_v6 = vsub.f32 %v2721_v36, %v2736_v39 }
 0x390   : > { %v1786_v31 = vpop.eup %1785  ;;  %1803 = vpow2.f32 %v933_v1  ;;  %v3204_v36 = vsub.f32 %v2740_v41, %v2755_v9  ;;  %v3206_v41 = vsub.f32 %v2757_v62, %v2771_v52  ;;  %v3209_v62 = vsub.f32 %v2778_v49, %v2794_v42 }
 0x391   : > { %v1788_v26 = vpop.eup %1787  ;;  %v1109_v18 = vadd.f32 %v1784_v59, %v1108_v28  ;;  %1805 = vpow2.f32 %v1100_v29  ;;  %v745_v1 = vmul.f32 1.442695, %v3198_v51  ;;  %v3199_v59 = vsub.f32 %v2702_v57, %v2717_v48 }
 0x392   : > { %v1790_v30 = vpop.eup %1789  ;;  %v3200_v28 = vsub.f32 %v2690_v58, %v2695_v19  ;;  %v753_v20 = vmul.f32 1.442695, %v3202_v6  ;;  %v3203_v58 = vsub.f32 %v2719_v25, %v2733_v10  ;;  %v757_v39 = vmul.f32 1.442695, %v3204_v36  ;;  %v780_v25 = vld [vmem:[#allocation3 + $0x18] sm:$0xff] }
 0x393   : > { %957 = vadd.xlane.f32.xlu0 %v1790_v30  ;;  %959 = vadd.xlane.f32.xlu1 %v1768_v40  ;;  %v1110_v14 = vadd.f32 %v1786_v31, %v1109_v18  ;;  %v1792_v3 = vpop.eup %1791  ;;  %v1043_v40 = vmul.f32 1.442695, %v1042_v47  ;;  %v747_v29 = vmul.f32 1.442695, %v3199_v59  ;;  %v763_v9 = vmul.f32 1.442695, %v3206_v41 }
 0x394   : > { %v1794_v17 = vpop.eup %1793  ;;  %v749_v31 = vmul.f32 1.442695, %v3200_v28  ;;  %v755_v19 = vmul.f32 1.442695, %v3203_v58  ;;  %v765_v52 = vmul.f32 1.442695, %v3209_v62 }
 0x395   : > { %v1111_v12 = vadd.f32 %v1788_v26, %v1110_v14  ;;  %1807 = vpow2.f32 %v1043_v40  ;;  %v3201_v26 = vsub.f32 %v2700_v22, %v2714_v24  ;;  %v777_v14 = vld [vmem:[#allocation3] sm:$0xff]  ;;  %v3212_v28 = vld [vmem:[#allocation37_spill] sm:$0xff] }
 0x396   : > { %v1796_v44 = vpop.eup %1795  ;;  %1809 = vpow2.f32 %v745_v1 }
 0x397   : > { %v1798_v7 = vpop.eup %1797  ;;  %961 = vadd.xlane.f32.xlu0 %v1796_v44  ;;  %963 = vadd.xlane.f32.xlu1 %v1776_v45  ;;  %v1112_v50 = vadd.f32 %v1792_v3, %v1111_v12  ;;  %1811 = vpow2.f32 %v747_v29  ;;  %v751_v18 = vmul.f32 1.442695, %v3201_v26  ;;  %v784_v29 = vld [vmem:[#allocation3 + $0x38] sm:$0xff] }
 0x398   : > { %v1800_v38 = vpop.eup %1799  ;;  %1813 = vpow2.f32 %v749_v31  ;;  %v3213_v31 = vld [vmem:[#allocation39_spill] sm:$0xff] }
 0x399   : > { %v1802_v11 = vpop.eup %1801  ;;  %v1113_v13 = vadd.f32 %v1794_v17, %v1112_v50  ;;  %1815 = vpow2.f32 %v751_v18  ;;  %v778_v17 = vld [vmem:[#allocation3 + $0x8] sm:$0xff]  ;;  %v3214_v26 = vsub.f32 %v3212_v28, %v3213_v31 }
 0x39a   : > { %v1804_v2 = vpop.eup %1803  ;;  %1817 = vpow2.f32 %v753_v20  ;;  %v1179_v31 = vld [vmem:[#allocation2 + $0x8] sm:$0xff] (!%p1498_p7) }
 0x39b   : > { %965 = vadd.xlane.f32.xlu0 %v1804_v2  ;;  %967 = vadd.xlane.f32.xlu1 %v1798_v7  ;;  %v1114_v0 = vadd.f32 %v1800_v38, %v1113_v13  ;;  %v1806_v54 = vpop.eup %1805  ;;  %v779_v7 = vld [vmem:[#allocation3 + $0x10] sm:$0xff]  ;;  %1819 = vpow2.f32 %v755_v19  ;;  %v3205_v13 = vsub.f32 %v2738_v21, %v2752_v56  ;;  %v775_v18 = vmul.f32 1.442695, %v3214_v26 }
 0x39c   : > { %1821 = vpow2.f32 %v757_v39 }
 0x39d   : > { %v1115_v61 = vadd.f32 %v1802_v11, %v1114_v0  ;;  %v759_v2 = vmul.f32 1.442695, %v3205_v13 }
 0x39f   : > { %v1116_v5 = vadd.f32 %v1806_v54, %v1115_v61  ;;  %v1808_v32 = vpop.eup %1807  ;;  %v781_v61 = vld [vmem:[#allocation3 + $0x20] sm:$0xff]  ;;  %1823 = vpow2.f32 %v759_v2  ;;  %v790_v2 = vld [vmem:[#allocation3 + $0x68] sm:$0xff] }
 0x3a0   : > { %v1047_v15 = vmul.f32 %v1808_v32, %v1046_v8  ;;  %v1810_v30 = vpop.eup %1809  ;;  %v782_v32 = vld [vmem:[#allocation3 + $0x28] sm:$0xff]  ;;  %1825 = vpow2.f32 %v763_v9  ;;  %v3208_v8 = vsub.f32 %v2776_v55, %v2791_v60  ;;  %v3211_v60 = vsub.f32 %v2798_v37, %v2814_v46 }
 0x3a1   : > { %v1117_v63 = vrot.slane %v1116_v5, 4  ;;  %v793_v3 = vmul.f32 %v1810_v30, %v777_v14  ;;  %v1812_v57 = vpop.eup %1811 }
 0x3a2   : > { %v794_v22 = vmul.f32 %v1812_v57, %v778_v17  ;;  %v1814_v24 = vpop.eup %1813  ;;  %v769_v55 = vmul.f32 1.442695, %v3211_v60  ;;  %v786_v57 = vld [vmem:[#allocation3 + $0x48] sm:$0xff] }
 0x3a3   : > { %v1118_v45 = vadd.f32 %v1117_v63, %v1116_v5  ;;  %v795_v38 = vmul.f32 %v1814_v24, %v779_v7  ;;  %v1816_v11 = vpop.eup %1815  ;;  %v3207_v63 = vsub.f32 %v2759_v4, %v2774_v43  ;;  %v788_v7 = vld [vmem:[#allocation3 + $0x58] sm:$0xff] }
 0x3a4   : > { %v796_v40 = vmul.f32 %v1816_v11, %v780_v25  ;;  %v1818_v0 = vpop.eup %1817 }
 0x3a5   : > { %v1119_v35 = vrot.slane %v1118_v45, 2  ;;  %v797_v21 = vmul.f32 %v1818_v0, %v781_v61  ;;  %v1820_v56 = vpop.eup %1819 }
 0x3a6   : > { %v798_v4 = vmul.f32 %v1820_v56, %v782_v32  ;;  %v1822_v43 = vpop.eup %1821  ;;  %v791_v56 = vld [vmem:[#allocation3 + $0x70] sm:$0xff] }
 0x3a7   : > { %v1120_v16 = vadd.f32 %v1119_v35, %v1118_v45  ;;  %v761_v45 = vmul.f32 1.442695, %v3207_v63 }
 0x3a9   : > { %v1121_v33 = vrot.slane %v1120_v16, 1  ;;  %1827 = vpow2.f32 %v761_v45  ;;  %v1824_v42 = vpop.eup %1823 }
 0x3aa   : > { %v1826_v20 = vpop.eup %1825  ;;  %v800_v46 = vmul.f32 %v1824_v42, %v784_v29 }
 0x3ab   : > { %v1122_v34 = vadd.f32 %v1121_v33, %v1120_v16  ;;  %v767_v16 = vmul.f32 1.442695, %v3208_v8  ;;  %v802_v58 = vmul.f32 %v1826_v20, %v786_v57  ;;  %v1211_v20 = vld [vmem:[#allocation4 + $0x8] sm:$0xff] (!%p1498_p7)  ;;  %v1258_v57 = vld [vmem:[#allocation5] sm:$0xff] (!%p1498_p7) }
 0x3ad   : > { %v1123_v27 = vadd.f32 %v1122_v34, %v1047_v15  ;;  %v783_v34 = vld [vmem:[#allocation3 + $0x30] sm:$0xff]  ;;  %1829 = vpow2.f32 %v767_v16 }
 0x3ae   : > { %1831 = vpow2.f32 %v765_v52  ;;  %v799_v49 = vmul.f32 %v1822_v43, %v783_v34 }
 0x3af   : > { %1124 = vst [vmem:[%s2932_s7] sm:$0x1] %v1123_v27  ;;  %v3210_v27 = vsub.f32 %v2796_v23, %v2811_v53  ;;  %v3215_v53 = vld [vmem:[#allocation38_spill] sm:$0xff]  ;;  %v3216_v23 = vld [vmem:[#allocation40_spill] sm:$0xff] }
 0x3b0   : > { %v3217_v14 = vsub.f32 %v3215_v53, %v3216_v23  ;;  %v1180_v23 = vld [vmem:[#allocation2 + $0x10] sm:$0xff] (!%p1498_p7) }
 0x3b1   : > { %v771_v51 = vmul.f32 1.442695, %v3210_v27 }
 0x3b2   : > { %v773_v6 = vmul.f32 1.442695, %v3217_v14 }
 0x3b3   : > { %1833 = vpow2.f32 %v771_v51  ;;  %v1828_v37 = vpop.eup %1827 }
 0x3b4   : > { %1835 = vpow2.f32 %v769_v55 }
 0x3b5   : > { %1837 = vpow2.f32 %v775_v18 }
 0x3b6   : > { %1839 = vpow2.f32 %v773_v6 }
 0x3fc   : > { %v938_v48 = vpop.xlane.xlu1 %937 }
 0x3fd   : > { %v969_v12 = vadd.f32 %v938_v48, %v793_v3  ;;  %v785_v48 = vld [vmem:[#allocation3 + $0x40] sm:$0xff] }
 0x3fe   : > { %v801_v19 = vmul.f32 %v1828_v37, %v785_v48 }
 0x3ff   : > { %986 = vst.msk [vmem:[#allocation3] sm:$0xff] %vm985_vm13, %v969_v12  ;;  %v1830_v12 = vpop.eup %1829 }
 0x400   : > { %v940_v44 = vpop.xlane.xlu0 %939  ;;  %v804_v11 = vmul.f32 %v1830_v12, %v788_v7  ;;  %v1181_v12 = vld [vmem:[#allocation2 + $0x18] sm:$0xff] (!%p1498_p7)  ;;  %v1182_v7 = vld [vmem:[#allocation2 + $0x20] sm:$0xff] (!%p1498_p7) }
 0x401   : > { %v970_v50 = vadd.f32 %v940_v44, %v794_v22  ;;  %v1832_v22 = vpop.eup %1831 }
 0x403   : > { %987 = vst.msk [vmem:[#allocation3 + $0x8] sm:$0xff] %vm985_vm13, %v970_v50  ;;  %v787_v50 = vld [vmem:[#allocation3 + $0x50] sm:$0xff] }
 0x404   : > { %v942_v47 = vpop.xlane.xlu0 %941 }
 0x405   : > { %v971_v10 = vadd.f32 %v942_v47, %v795_v38  ;;  %v1834_v38 = vpop.eup %1833  ;;  %v803_v47 = vmul.f32 %v1832_v22, %v787_v50  ;;  %v1259_v22 = vld [vmem:[#allocation5 + $0x8] sm:$0xff] (!%p1498_p7) }
 0x406   : > { %v1836_v25 = vpop.eup %1835  ;;  %v806_v41 = vmul.f32 %v1834_v38, %v790_v2  ;;  %v1130_v43 = vld [vmem:[#allocation3] sm:$0xff] (!%p1498_p7)  ;;  %v1213_v38 = vld [vmem:[#allocation4 + $0x18] sm:$0xff] (!%p1498_p7) }
 0x407   : > { %988 = vst.msk [vmem:[#allocation3 + $0x10] sm:$0xff] %vm985_vm13, %v971_v10  ;;  %v1838_v61 = vpop.eup %1837  ;;  %1841 = vlog2.f32 (!%p1498_p7), %v1130_v43  ;;  %v1185_v43 = vld [vmem:[#allocation2 + $0x38] sm:$0xff] (!%p1498_p7) }
 0x408   : > { %v944_v54 = vpop.xlane.xlu1 %943 }
 0x409   : > { %v972_v5 = vadd.f32 %v944_v54, %v796_v40  ;;  %v789_v40 = vld [vmem:[#allocation3 + $0x60] sm:$0xff] }
 0x40a   : > { %v805_v9 = vmul.f32 %v1836_v25, %v789_v40  ;;  %v1260_v40 = vld [vmem:[#allocation5 + $0x10] sm:$0xff] (!%p1498_p7) }
 0x40b   : > { %989 = vst.msk [vmem:[#allocation3 + $0x18] sm:$0xff] %vm985_vm13, %v972_v5  ;;  %v1840_v5 = vpop.eup %1839 }
 0x40c   : > { %v946_v35 = vpop.xlane.xlu0 %945  ;;  %v807_v16 = vmul.f32 %v1840_v5, %v791_v56 }
 0x40d   : > { %v973_v15 = vadd.f32 %v946_v35, %v797_v21  ;;  %v792_v21 = vld [vmem:[#allocation3 + $0x78] sm:$0xff] }
 0x40e   : > { %v808_v8 = vmul.f32 %v1838_v61, %v792_v21  ;;  %v1132_v34 = vld [vmem:[#allocation3 + $0x10] sm:$0xff] (!%p1498_p7)  ;;  %v1215_v21 = vld [vmem:[#allocation4 + $0x28] sm:$0xff] (!%p1498_p7) }
 0x40f   : > { %990 = vst.msk [vmem:[#allocation3 + $0x20] sm:$0xff] %vm985_vm13, %v973_v15 }
 0x410   : > { %v948_v33 = vpop.xlane.xlu1 %947 }
 0x411   : > { %v974_v1 = vadd.f32 %v948_v33, %v798_v4  ;;  %v1131_v33 = vld [vmem:[#allocation3 + $0x8] sm:$0xff] (!%p1498_p7)  ;;  %v1842_v42 = vpop.eup (!%p1498_p7), %1841 }
 0x412   : > { %1843 = vlog2.f32 (!%p1498_p7), %v1131_v33  ;;  %v1133_v27 = vld [vmem:[#allocation3 + $0x18] sm:$0xff] (!%p1498_p7)  ;;  %v1147_v28 = vmul.f32 (!%p1498_p7), 0.6931472, %v1842_v42 }
 0x413   : > { %991 = vst.msk [vmem:[#allocation3 + $0x28] sm:$0xff] %vm985_vm13, %v974_v1  ;;  %1845 = vlog2.f32 (!%p1498_p7), %v1132_v34 }
 0x414   : > { %v950_v59 = vpop.xlane.xlu0 %949  ;;  %1847 = vlog2.f32 (!%p1498_p7), %v1133_v27 }
 0x415   : > { %v975_v30 = vadd.f32 %v950_v59, %v799_v49  ;;  %v1178_v59 = vld [vmem:[#allocation2] sm:$0xff] (!%p1498_p7) }
 0x416   : > { %v1134_v51 = vld [vmem:[#allocation3 + $0x20] sm:$0xff] (!%p1498_p7)  ;;  %v1194_v6 = vadd.f32 (!%p1498_p7), %v1178_v59, %v1147_v28  ;;  %v1216_v28 = vld [vmem:[#allocation4 + $0x30] sm:$0xff] (!%p1498_p7) }
 0x417   : > { %992 = vst.msk [vmem:[#allocation3 + $0x30] sm:$0xff] %vm985_vm13, %v975_v30  ;;  %1849 = vlog2.f32 (!%p1498_p7), %v1134_v51  ;;  %v1210_v30 = vld [vmem:[#allocation4] sm:$0xff] (!%p1498_p7) }
 0x418   : > { %v952_v3 = vpop.xlane.xlu1 %951  ;;  %v1262_v51 = vld [vmem:[#allocation5 + $0x20] sm:$0xff] (!%p1498_p7) }
 0x419   : > { %v976_v17 = vadd.f32 %v952_v3, %v800_v46 }
 0x41a   : > { %v1135_v1 = vld [vmem:[#allocation3 + $0x28] sm:$0xff] (!%p1498_p7) }
 0x41b   : > { %993 = vst.msk [vmem:[#allocation3 + $0x38] sm:$0xff] %vm985_vm13, %v976_v17  ;;  %1851 = vlog2.f32 (!%p1498_p7), %v1135_v1  ;;  %v1212_v17 = vld [vmem:[#allocation4 + $0x10] sm:$0xff] (!%p1498_p7) }
 0x41c   : > { %v956_v24 = vpop.xlane.xlu1 %955  ;;  %v954_v44 = vpop.xlane.xlu0 %953 }
 0x41d   : > { %v978_v36 = vadd.f32 %v956_v24, %v802_v58  ;;  %v977_v39 = vadd.f32 %v954_v44, %v801_v19  ;;  %v1844_v29 = vpop.eup (!%p1498_p7), %1843  ;;  %v1226_v19 = vsub.f32 (!%p1498_p7), %v1194_v6, %v1210_v30 }
 0x41e   : > { %v1136_v60 = vld [vmem:[#allocation3 + $0x30] sm:$0xff] (!%p1498_p7)  ;;  %v1846_v18 = vpop.eup (!%p1498_p7), %1845  ;;  %v1149_v53 = vmul.f32 (!%p1498_p7), 0.6931472, %v1844_v29  ;;  %v1263_v29 = vld [vmem:[#allocation5 + $0x28] sm:$0xff] (!%p1498_p7) }
 0x41f   : > { %995 = vst.msk [vmem:[#allocation3 + $0x48] sm:$0xff] %vm985_vm13, %v978_v36  ;;  %994 = vst.msk [vmem:[#allocation3 + $0x40] sm:$0xff] %vm985_vm13, %v977_v39  ;;  %1853 = vlog2.f32 (!%p1498_p7), %v1136_v60  ;;  %v1151_v46 = vmul.f32 (!%p1498_p7), 0.6931472, %v1846_v18  ;;  %v1848_v3 = vpop.eup (!%p1498_p7), %1847 }
 0x420   : > { %v960_v10 = vpop.xlane.xlu1 %959  ;;  %v958_v13 = vpop.xlane.xlu0 %957  ;;  %v1195_v48 = vadd.f32 (!%p1498_p7), %v1179_v31, %v1149_v53  ;;  %v1153_v44 = vmul.f32 (!%p1498_p7), 0.6931472, %v1848_v3  ;;  %v1217_v31 = vld [vmem:[#allocation4 + $0x38] sm:$0xff] (!%p1498_p7) }
 0x421   : > { %v980_v0 = vadd.f32 %v960_v10, %v804_v11  ;;  %v979_v54 = vadd.f32 %v958_v13, %v803_v47  ;;  %v1850_v58 = vpop.eup (!%p1498_p7), %1849  ;;  %v1196_v24 = vadd.f32 (!%p1498_p7), %v1180_v23, %v1151_v46  ;;  %v1183_v47 = vld [vmem:[#allocation2 + $0x28] sm:$0xff] (!%p1498_p7)  ;;  %v1242_v13 = vsel (!%p1498_p7), %vm508_vm5, %v1226_v19, 0.0  ;;  %v1188_v19 = vld [vmem:[#allocation2 + $0x50] sm:$0xff] (!%p1498_p7) }
 0x422   : > { %v1137_v55 = vld [vmem:[#allocation3 + $0x38] sm:$0xff] (!%p1498_p7)  ;;  %v1227_v39 = vsub.f32 (!%p1498_p7), %v1195_v48, %v1211_v20  ;;  %v1155_v11 = vmul.f32 (!%p1498_p7), 0.6931472, %v1850_v58  ;;  %v1218_v20 = vld [vmem:[#allocation4 + $0x40] sm:$0xff] (!%p1498_p7)  ;;  %v1187_v46 = vld [vmem:[#allocation2 + $0x48] sm:$0xff] (!%p1498_p7) }
 0x423   : > { %997 = vst.msk [vmem:[#allocation3 + $0x58] sm:$0xff] %vm985_vm13, %v980_v0  ;;  %996 = vst.msk [vmem:[#allocation3 + $0x50] sm:$0xff] %vm985_vm13, %v979_v54  ;;  %1855 = vlog2.f32 (!%p1498_p7), %v1137_v55  ;;  %v1228_v2 = vsub.f32 (!%p1498_p7), %v1196_v24, %v1212_v17  ;;  %v1197_v0 = vadd.f32 (!%p1498_p7), %v1181_v12, %v1153_v44  ;;  %v1214_v54 = vld [vmem:[#allocation4 + $0x20] sm:$0xff] (!%p1498_p7)  ;;  %v3223_v48 = vld [vmem:[#allocation29_spill] sm:$0xff] (!%p1498_p7) }
 0x424   : > { %v964_v63 = vpop.xlane.xlu1 %963  ;;  %v962_v45 = vpop.xlane.xlu0 %961  ;;  %v1186_v55 = vld [vmem:[#allocation2 + $0x40] sm:$0xff] (!%p1498_p7)  ;;  %v1220_v10 = vld [vmem:[#allocation4 + $0x50] sm:$0xff] (!%p1498_p7) }
 0x425   : > { %v982_v35 = vadd.f32 %v964_v63, %v806_v41  ;;  %v981_v32 = vadd.f32 %v962_v45, %v805_v9  ;;  %1129 = sbr.rel (%p1498_p7) target bundleno = 1097 (0x449), region = 56  ;;  %v1852_v36 = vpop.eup (!%p1498_p7), %1851  ;;  %v1274_v9 = vadd.f32 (!%p1498_p7), %v1258_v57, %v1242_v13  ;;  %v1243_v63 = vsel (!%p1498_p7), %vm509_vm2, %v1227_v39, 0.0  ;;  %v1219_v39 = vld [vmem:[#allocation4 + $0x48] sm:$0xff] (!%p1498_p7)  ;;  %v3233_v53 = vld [vmem:[#allocation26_spill] sm:$0xff] (!%p1498_p7) }
 0x426   : > { %v1138_v49 = vld [vmem:[#allocation3 + $0x40] sm:$0xff] (!%p1498_p7)  ;;  %v1139_v26 = vld [vmem:[#allocation3 + $0x48] sm:$0xff] (!%p1498_p7)  ;;  %v1157_v61 = vmul.f32 (!%p1498_p7), 0.6931472, %v1852_v36  ;;  %v1198_v45 = vadd.f32 (!%p1498_p7), %v1182_v7, %v1155_v11  ;;  %vm3224_vm2 = vcmp.lt.s32.totalorder (!%p1498_p7), %v3223_v48, 200  ;;  %v1264_v7 = vld [vmem:[#allocation5 + $0x30] sm:$0xff] (!%p1498_p7) }
 0x427   : > { %999 = vst.msk [vmem:[#allocation3 + $0x68] sm:$0xff] %vm985_vm13, %v982_v35  ;;  %998 = vst.msk [vmem:[#allocation3 + $0x60] sm:$0xff] %vm985_vm13, %v981_v32  ;;  %1857 = vlog2.f32 (!%p1498_p7), %v1138_v49  ;;  %v1275_v32 = vadd.f32 (!%p1498_p7), %v1259_v22, %v1243_v63  ;;  %v1265_v36 = vld [vmem:[#allocation5 + $0x38] sm:$0xff] (!%p1498_p7)  ;;  %v3235_v48 = vld [vmem:[#allocation32_spill] sm:$0xff] (!%p1498_p7) }
 0x428   : > { %v968_v15 = vpop.xlane.xlu1 %967  ;;  %v966_v62 = vpop.xlane.xlu0 %965  ;;  %1859 = vlog2.f32 (!%p1498_p7), %v1139_v26  ;;  %1290 = vst.msk [vmem:[#allocation5] sm:$0xff] (!%p1498_p7), %vm985_vm13, %v1274_v9  ;;  %v1230_v27 = vsub.f32 (!%p1498_p7), %v1198_v45, %v1214_v54  ;;  %v3227_v45 = vld [vmem:[#allocation24_spill] sm:$0xff] (!%p1498_p7) }
 0x429   : > { %v984_v52 = vadd.f32 %v968_v15, %v808_v8  ;;  %v983_v4 = vadd.f32 %v966_v62, %v807_v16  ;;  %v1854_v41 = vpop.eup (!%p1498_p7), %1853  ;;  %v1244_v16 = vsel (!%p1498_p7), %vm510_vm12, %v1228_v2, 0.0  ;;  %v1229_v15 = vsub.f32 (!%p1498_p7), %v1197_v0, %v1213_v38  ;;  %v1261_v62 = vld [vmem:[#allocation5 + $0x18] sm:$0xff] (!%p1498_p7)  ;;  %1291 = vst.msk [vmem:[#allocation5 + $0x8] sm:$0xff] (!%p1498_p7), %vm985_vm13, %v1275_v32  ;;  %v1190_v8 = vld [vmem:[#allocation2 + $0x60] sm:$0xff] (!%p1498_p7) }
 0x42a   : > { %v1140_v14 = vld [vmem:[#allocation3 + $0x50] sm:$0xff] (!%p1498_p7)  ;;  %v1141_v37 = vld [vmem:[#allocation3 + $0x58] sm:$0xff] (!%p1498_p7)  ;;  %v1276_v34 = vadd.f32 (!%p1498_p7), %v1260_v40, %v1244_v16  ;;  %v1159_v1 = vmul.f32 (!%p1498_p7), 0.6931472, %v1854_v41  ;;  %v1246_v23 = vsel (!%p1498_p7), %vm512_vm11, %v1230_v27, 0.0  ;;  %vm3228_vm5 = vcmp.lt.s32.totalorder (!%p1498_p7), %v3227_v45, 200 }
 0x42b   : > { %1001 = vst.msk [vmem:[#allocation3 + $0x78] sm:$0xff] %vm985_vm13, %v984_v52  ;;  %1000 = vst.msk [vmem:[#allocation3 + $0x70] sm:$0xff] %vm985_vm13, %v983_v4  ;;  %1861 = vlog2.f32 (!%p1498_p7), %v1140_v14  ;;  %v1199_v52 = vadd.f32 (!%p1498_p7), %v1183_v47, %v1157_v61  ;;  %v1184_v4 = vld [vmem:[#allocation2 + $0x30] sm:$0xff] (!%p1498_p7)  ;;  %v1245_v42 = vsel (!%p1498_p7), %vm511_vm9, %v1229_v15, 0.0  ;;  %v1278_v57 = vadd.f32 (!%p1498_p7), %v1262_v51, %v1246_v23  ;;  %v1266_v47 = vld [vmem:[#allocation5 + $0x40] sm:$0xff] (!%p1498_p7) }
 0x42c   : > { %1863 = vlog2.f32 %v1141_v37  ;;  %1292 = vst.msk [vmem:[#allocation5 + $0x10] sm:$0xff] %vm985_vm13, %v1276_v34  ;;  %v1277_v30 = vadd.f32 %v1261_v62, %v1245_v42  ;;  %v1200_v14 = vadd.f32 %v1184_v4, %v1159_v1  ;;  %v1189_v2 = vld [vmem:[#allocation2 + $0x58] sm:$0xff]  ;;  %v1222_v51 = vld [vmem:[#allocation4 + $0x60] sm:$0xff]  ;;  %vm3234_vm12 = vcmp.lt.s32.totalorder %v3233_v53, 200 }
 0x42d   : > { %v1856_v35 = vpop.eup %1855  ;;  %v1231_v59 = vsub.f32 %v1199_v52, %v1215_v21  ;;  %1294 = vst.msk [vmem:[#allocation5 + $0x20] sm:$0xff] %vm985_vm13, %v1278_v57  ;;  %v1221_v32 = vld [vmem:[#allocation4 + $0x58] sm:$0xff]  ;;  %v1268_v52 = vld [vmem:[#allocation5 + $0x50] sm:$0xff]  ;;  %vm3236_vm11 = vcmp.lt.s32.totalorder %v3235_v48, 200 }
 0x42e   : > { %v1142_v50 = vld [vmem:[#allocation3 + $0x60] sm:$0xff]  ;;  %v1143_v25 = vld [vmem:[#allocation3 + $0x68] sm:$0xff]  ;;  %v1161_v60 = vmul.f32 0.6931472, %v1856_v35  ;;  %1293 = vst.msk [vmem:[#allocation5 + $0x18] sm:$0xff] %vm985_vm13, %v1277_v30  ;;  %v1232_v44 = vsub.f32 %v1200_v14, %v1216_v28  ;;  %v3229_v34 = vld [vmem:[#allocation22_spill] sm:$0xff] }
 0x42f   : > { %1865 = vlog2.f32 %v1142_v50  ;;  %v1247_v17 = vsel %vm3224_vm2, %v1231_v59, 0.0  ;;  %v1267_v35 = vld [vmem:[#allocation5 + $0x48] sm:$0xff]  ;;  %v1269_v59 = vld [vmem:[#allocation5 + $0x58] sm:$0xff]  ;;  %v1192_v30 = vld [vmem:[#allocation2 + $0x70] sm:$0xff] }
 0x430   : > { %1867 = vlog2.f32 %v1143_v25  ;;  %v1201_v6 = vadd.f32 %v1185_v43, %v1161_v60  ;;  %v1279_v24 = vadd.f32 %v1263_v29, %v1247_v17  ;;  %v1248_v54 = vsel %vm514_vm6, %v1232_v44, 0.0  ;;  %v1223_v28 = vld [vmem:[#allocation4 + $0x68] sm:$0xff]  ;;  %v1224_v57 = vld [vmem:[#allocation4 + $0x70] sm:$0xff]  ;;  %v1193_v44 = vld [vmem:[#allocation2 + $0x78] sm:$0xff] }
 0x431   : > { %v1858_v33 = vpop.eup %1857  ;;  %v1280_v5 = vadd.f32 %v1264_v7, %v1248_v54 }
 0x432   : > { %v1144_v56 = vld [vmem:[#allocation3 + $0x70] sm:$0xff]  ;;  %v1163_v26 = vmul.f32 0.6931472, %v1858_v33  ;;  %v1860_v18 = vpop.eup %1859  ;;  %v1145_v37 = vld [vmem:[#allocation3 + $0x78] sm:$0xff]  ;;  %v1233_v50 = vsub.f32 %v1201_v6, %v1217_v31  ;;  %1295 = vst.msk [vmem:[#allocation5 + $0x28] sm:$0xff] %vm985_vm13, %v1279_v24  ;;  %v1191_v33 = vld [vmem:[#allocation2 + $0x68] sm:$0xff] }
 0x433   : > { %1869 = vlog2.f32 %v1144_v56  ;;  %v1165_v58 = vmul.f32 0.6931472, %v1860_v18  ;;  %1296 = vst.msk [vmem:[#allocation5 + $0x30] sm:$0xff] %vm985_vm13, %v1280_v5  ;;  %v1270_v6 = vld [vmem:[#allocation5 + $0x60] sm:$0xff] }
 0x434   : > { %v1202_v12 = vadd.f32 %v1186_v55, %v1163_v26  ;;  %1871 = vlog2.f32 %v1145_v37  ;;  %v1249_v41 = vsel %vm515_vm7, %v1233_v50, 0.0  ;;  %vm3230_vm7 = vcmp.lt.s32.totalorder %v3229_v34, 200  ;;  %v3231_v55 = vld [vmem:[#allocation28_spill] sm:$0xff] }
 0x435   : > { %v1862_v3 = vpop.eup %1861  ;;  %v1203_v25 = vadd.f32 %v1187_v46, %v1165_v58  ;;  %v1281_v63 = vadd.f32 %v1265_v36, %v1249_v41  ;;  %vm3232_vm9 = vcmp.lt.s32.totalorder %v3231_v55, 200  ;;  %v1272_v36 = vld [vmem:[#allocation5 + $0x70] sm:$0xff] }
 0x436   : > { %v1864_v22 = vpop.eup %1863  ;;  %v1167_v38 = vmul.f32 0.6931472, %v1862_v3  ;;  %v1234_v11 = vsub.f32 %v1202_v12, %v1218_v20  ;;  %v1271_v3 = vld [vmem:[#allocation5 + $0x68] sm:$0xff] }
 0x437   : > { %v1169_v13 = vmul.f32 0.6931472, %v1864_v22  ;;  %v1235_v56 = vsub.f32 %v1203_v25, %v1219_v39  ;;  %1297 = vst.msk [vmem:[#allocation5 + $0x38] sm:$0xff] %vm985_vm13, %v1281_v63  ;;  %v3237_v22 = vld [vmem:[#allocation30_spill] sm:$0xff] }
 0x438   : > { %v1204_v9 = vadd.f32 %v1188_v19, %v1167_v38  ;;  %v1250_v21 = vsel %vm3228_vm5, %v1234_v11, 0.0  ;;  %vm3238_vm6 = vcmp.lt.s32.totalorder %v3237_v22, 200  ;;  %v1225_v38 = vld [vmem:[#allocation4 + $0x78] sm:$0xff] }
 0x439   : > { %v1866_v40 = vpop.eup %1865  ;;  %v1282_v15 = vadd.f32 %v1266_v47, %v1250_v21  ;;  %v1205_v4 = vadd.f32 %v1189_v2, %v1169_v13  ;;  %v1251_v27 = vsel %vm3230_vm7, %v1235_v56, 0.0  ;;  %v1273_v2 = vld [vmem:[#allocation5 + $0x78] sm:$0xff] }
 0x43a   : > { %v1868_v16 = vpop.eup %1867  ;;  %v1236_v62 = vsub.f32 %v1204_v9, %v1220_v10  ;;  %v1171_v43 = vmul.f32 0.6931472, %v1866_v40  ;;  %v1283_v60 = vadd.f32 %v1267_v35, %v1251_v27 }
 0x43b   : > { %v1173_v1 = vmul.f32 0.6931472, %v1868_v16  ;;  %1298 = vst.msk [vmem:[#allocation5 + $0x40] sm:$0xff] %vm985_vm13, %v1282_v15  ;;  %v1237_v42 = vsub.f32 %v1205_v4, %v1221_v32 }
 0x43c   : > { %v1252_v49 = vsel %vm3232_vm9, %v1236_v62, 0.0  ;;  %v1206_v29 = vadd.f32 %v1190_v8, %v1171_v43  ;;  %1299 = vst.msk [vmem:[#allocation5 + $0x48] sm:$0xff] %vm985_vm13, %v1283_v60 }
 0x43d   : > { %v1870_v31 = vpop.eup %1869  ;;  %v1284_v26 = vadd.f32 %v1268_v52, %v1252_v49  ;;  %v1207_v18 = vadd.f32 %v1191_v33, %v1173_v1  ;;  %v1253_v23 = vsel %vm3234_vm12, %v1237_v42, 0.0 }
 0x43e   : > { %v1238_v14 = vsub.f32 %v1206_v29, %v1222_v51  ;;  %v1175_v20 = vmul.f32 0.6931472, %v1870_v31  ;;  %v1285_v46 = vadd.f32 %v1269_v59, %v1253_v23  ;;  %v1872_v58 = vpop.eup %1871 }
 0x43f   : > { %1300 = vst.msk [vmem:[#allocation5 + $0x50] sm:$0xff] %vm985_vm13, %v1284_v26  ;;  %v1239_v37 = vsub.f32 %v1207_v18, %v1223_v28  ;;  %v1177_v39 = vmul.f32 0.6931472, %v1872_v58 }
 0x440   : > { %v1254_v17 = vsel %vm3236_vm11, %v1238_v14, 0.0  ;;  %v1208_v12 = vadd.f32 %v1192_v30, %v1175_v20  ;;  %1301 = vst.msk [vmem:[#allocation5 + $0x58] sm:$0xff] %vm985_vm13, %v1285_v46 }
 0x441   : > { %v1286_v19 = vadd.f32 %v1270_v6, %v1254_v17  ;;  %v1255_v24 = vsel %vm3238_vm6, %v1239_v37, 0.0  ;;  %v1209_v25 = vadd.f32 %v1193_v44, %v1177_v39 }
 0x442   : > { %v1287_v7 = vadd.f32 %v1271_v3, %v1255_v24  ;;  %v1240_v50 = vsub.f32 %v1208_v12, %v1224_v57 }
 0x443   : > { %1302 = vst.msk [vmem:[#allocation5 + $0x60] sm:$0xff] %vm985_vm13, %v1286_v19  ;;  %v1241_v13 = vsub.f32 %v1209_v25, %v1225_v38 }
 0x444   : > { %1303 = vst.msk [vmem:[#allocation5 + $0x68] sm:$0xff] %vm985_vm13, %v1287_v7  ;;  %v1256_v47 = vsel %vm522_vm1, %v1240_v50, 0.0 }
 0x445   : > { %v1288_v10 = vadd.f32 %v1272_v36, %v1256_v47  ;;  %v1257_v0 = vsel %vm523_vm15, %v1241_v13, 0.0 }
 0x446   : > { %v1289_v54 = vadd.f32 %v1273_v2, %v1257_v0 }
 0x447   : > { %1304 = vst.msk [vmem:[#allocation5 + $0x70] sm:$0xff] %vm985_vm13, %v1288_v10 }
 0x448   : > { %1305 = vst.msk [vmem:[#allocation5 + $0x78] sm:$0xff] %vm985_vm13, %v1289_v54 }
 0x449 PF: > { %p1306_p12 = scmp.eq.s32.totalorder %s2007_s18, 1  ;;  %p1499_p0 = scmp.ne.s32.totalorder %s2007_s18, 1 }
 0x44a   : > { %v1310_v61 = vld [vmem:[%s2932_s7] sm:$0x1] (!%p1499_p0)  ;;  %s1315_s8 = scalar_lea.vmem (!%p1499_p0), [#allocation8], %s2003_s17  ;;  %v1319_v56 = vld [vmem:[#allocation9] sm:$0x1] (!%p1499_p0) }
 0x44b   : > { %1309 = sbr.rel (%p1499_p0) target bundleno = 1120 (0x460), region = 60  ;;  %1873 = vlog2.f32 (!%p1499_p0), %v1310_v61  ;;  %v1313_v9 = vld [vmem:[%s2871_s5] sm:$0x1] (!%p1499_p0) }
 0x44c   : > { %v1316_v63 = vld [vmem:[%s1315_s8] sm:$0x1] (!%p1499_p0) }
 0x455   : > { %v1874_v41 = vpop.eup %1873 }
 0x456   : > { %v1312_v5 = vmul.f32 0.6931472, %v1874_v41 }
 0x458   : > { %v1314_v45 = vadd.f32 %v1313_v9, %v1312_v5 }
 0x45a   : > { %v1317_v21 = vsub.f32 %v1314_v45, %v1316_v63 }
 0x45c   : > { %v1318_v32 = vsel %vm524_vm3, %v1317_v21, 0.0 }
 0x45d   : > { %v1320_v8 = vadd.f32 %v1319_v56, %v1318_v32 }
 0x45f   : > { %1321 = vst [vmem:[#allocation9] sm:$0x1] %v1320_v8 }
 0x460 PF: > { %p1322_p3 = pnand %p1306_p12, %p1126_p10 }
 0x461   : > { %v1326_v16 = vld [vmem:[#allocation5] sm:$0xff] (!%p1322_p3)  ;;  %v1327_v15 = vld [vmem:[#allocation5 + $0x8] sm:$0xff] (!%p1322_p3)  ;;  %v1328_v62 = vld [vmem:[#allocation5 + $0x10] sm:$0xff] (!%p1322_p3)  ;;  %vm1383_vm3 = vcmask (!%p1322_p3), 1040384  }
 0x462   : > { %1325 = sbr.rel (%p1322_p3) target bundleno = 1366 (0x556), region = 64  ;;  %v1329_v52 = vld [vmem:[#allocation5 + $0x18] sm:$0xff] (!%p1322_p3)  ;;  %v1342_v4 = vsel (!%p1322_p3), %vm985_vm13, %v1326_v16, 0.0  ;;  %v1343_v43 = vsel (!%p1322_p3), %vm985_vm13, %v1327_v15, 0.0  ;;  %v1345_v33 = vsel (!%p1322_p3), %vm985_vm13, %v1328_v62, 0.0  ;;  %v1330_v34 = vld [vmem:[#allocation5 + $0x20] sm:$0xff] (!%p1322_p3) }
 0x463   : > { %v1344_v27 = vadd.f32 (!%p1322_p3), %v1343_v43, %v1342_v4  ;;  %v1347_v51 = vsel (!%p1322_p3), %vm985_vm13, %v1329_v52, 0.0  ;;  %v1331_v1 = vld [vmem:[#allocation5 + $0x28] sm:$0xff] (!%p1322_p3)  ;;  %v1349_v55 = vsel (!%p1322_p3), %vm985_vm13, %v1330_v34, 0.0  ;;  %v1332_v49 = vld [vmem:[#allocation5 + $0x30] sm:$0xff] (!%p1322_p3)  ;;  %v1333_v29 = vld [vmem:[#allocation5 + $0x38] sm:$0xff] (!%p1322_p3) }
 0x464   : > { %v1351_v59 = vsel (!%p1322_p3), %vm985_vm13, %v1331_v1, 0.0  ;;  %v1353_v31 = vsel (!%p1322_p3), %vm985_vm13, %v1332_v49, 0.0  ;;  %v1334_v26 = vld [vmem:[#allocation5 + $0x40] sm:$0xff] (!%p1322_p3)  ;;  %v1355_v30 = vsel (!%p1322_p3), %vm985_vm13, %v1333_v29, 0.0  ;;  %v1335_v53 = vld [vmem:[#allocation5 + $0x48] sm:$0xff] (!%p1322_p3)  ;;  %v1336_v6 = vld [vmem:[#allocation5 + $0x50] sm:$0xff] (!%p1322_p3) }
 0x465   : > { %v1346_v60 = vadd.f32 (!%p1322_p3), %v1345_v33, %v1344_v27  ;;  %v1357_v14 = vsel (!%p1322_p3), %vm985_vm13, %v1334_v26, 0.0  ;;  %v1359_v46 = vsel (!%p1322_p3), %vm985_vm13, %v1335_v53, 0.0  ;;  %v1337_v37 = vld [vmem:[#allocation5 + $0x58] sm:$0xff] (!%p1322_p3)  ;;  %v1361_v57 = vsel (!%p1322_p3), %vm985_vm13, %v1336_v6, 0.0  ;;  %v1338_v48 = vld [vmem:[#allocation5 + $0x60] sm:$0xff] (!%p1322_p3)  ;;  %v1339_v58 = vld [vmem:[#allocation5 + $0x68] sm:$0xff] (!%p1322_p3) }
 0x466   : > { %v1363_v12 = vsel (!%p1322_p3), %vm985_vm13, %v1337_v37, 0.0  ;;  %v1365_v22 = vsel (!%p1322_p3), %vm985_vm13, %v1338_v48, 0.0  ;;  %v1340_v24 = vld [vmem:[#allocation5 + $0x70] sm:$0xff] (!%p1322_p3)  ;;  %v1367_v7 = vsel (!%p1322_p3), %vm985_vm13, %v1339_v58, 0.0  ;;  %v1341_v50 = vld [vmem:[#allocation5 + $0x78] sm:$0xff] (!%p1322_p3) }
 0x467   : > { %v1348_v42 = vadd.f32 (!%p1322_p3), %v1347_v51, %v1346_v60  ;;  %v1369_v39 = vsel (!%p1322_p3), %vm985_vm13, %v1340_v24, 0.0  ;;  %v1371_v11 = vsel (!%p1322_p3), %vm985_vm13, %v1341_v50, 0.0  ;;  %v1382_v10 = vld [vmem:[#allocation9] sm:$0x1] (!%p1322_p3) }
 0x468   : > { %v1384_v13 = vsel (!%p1322_p3), %vm1383_vm3, %v1382_v10, 0.0 }
 0x469   : > { %v1350_v28 = vadd.f32 %v1349_v55, %v1348_v42 }
 0x46b   : > { %v1352_v18 = vadd.f32 %v1351_v59, %v1350_v28 }
 0x46d   : > { %v1354_v23 = vadd.f32 %v1353_v31, %v1352_v18 }
 0x46f   : > { %v1356_v20 = vadd.f32 %v1355_v30, %v1354_v23 }
 0x471   : > { %v1358_v3 = vadd.f32 %v1357_v14, %v1356_v20 }
 0x473   : > { %v1360_v17 = vadd.f32 %v1359_v46, %v1358_v3 }
 0x475   : > { %v1362_v19 = vadd.f32 %v1361_v57, %v1360_v17 }
 0x477   : > { %v1364_v44 = vadd.f32 %v1363_v12, %v1362_v19 }
 0x479   : > { %v1366_v36 = vadd.f32 %v1365_v22, %v1364_v44 }
 0x47b   : > { %v1368_v38 = vadd.f32 %v1367_v7, %v1366_v36 }
 0x47d   : > { %v1370_v47 = vadd.f32 %v1369_v39, %v1368_v38 }
 0x47f   : > { %v1372_v25 = vadd.f32 %v1371_v11, %v1370_v47 }
 0x481   : > { %1373 = vadd.xlane.f32.xlu0 %v1372_v25 }
 0x485   : > { %1385 = vadd.xlane.f32.xlu0 %v1384_v13 }
 0x50e   : > { %v1374_v2 = vpop.xlane.xlu0 %1373 }
 0x50f   : > { %v1375_v40 = vrot.slane %v1374_v2, 4 }
 0x511   : > { %v1376_v0 = vadd.f32 %v1375_v40, %v1374_v2 }
 0x512   : > { %v1386_v54 = vpop.xlane.xlu0 %1385 }
 0x513   : > { %v1377_v61 = vrot.slane %v1376_v0, 2  ;;  %v1387_v41 = vrot.slane %v1386_v54, 4 }
 0x515   : > { %v1388_v9 = vadd.f32 %v1387_v41, %v1386_v54  ;;  %v1378_v5 = vadd.f32 %v1377_v61, %v1376_v0 }
 0x517   : > { %v1389_v63 = vrot.slane %v1388_v9, 2  ;;  %v1379_v45 = vrot.slane %v1378_v5, 1 }
 0x519   : > { %v1390_v21 = vadd.f32 %v1389_v63, %v1388_v9  ;;  %v1380_v56 = vadd.f32 %v1379_v45, %v1378_v5 }
 0x51b   : > { %1641 = vpush %v1380_v56  ;;  %v1391_v35 = vrot.slane %v1390_v21, 1 }
 0x51d   : > { %v1392_v32 = vadd.f32 %v1391_v35, %v1390_v21 }
 0x51f   : > { %1643 = vpush %v1392_v32 }
 0x54c   : > { %s1642_s17 = spop %1641 }
 0x550   : > { %s1644_s18 = spop %1643 }
 0x551   : > { %s1394_s12 = sadd.f32 %s1644_s18, %s1642_s17 }
 0x553   : > { %s1397_s25 = smul.f32 0.0025, %s1394_s12 }
 0x555   : > { %1399 = sst [smem:[#allocation16]] %s1397_s25 }
 0x556 PF: > { %p1666_p6 = scmp.eq.s32.totalorder %s1484_s0, 3  ;;  %s1933_s29 = scalar_lea.hbm %s3118_s3, 16 }
 0x557   : > { %p1934_p13 = scmp.ne.s32.totalorder %s3118_s3, %s1933_s29  ;;  %p1939_p11 = scmp.lt.u32.totalorder %s1933_s29, %s3118_s3 }
 0x559   : > { %p1935_p2 = pnand %p1934_p13, %p1666_p6 }
 0x55b   : > { %p1936_p1 = pneg %p1935_p2 }
 0x55d   : > { %p1941_p4 = pnand %p1939_p11, %p1936_p1 }
 0x55f   : > { %1944 = shalt.err (!%p1941_p4)
}
 0x560   : > { %s2030_s22 = smov [#allocation16]  }
 0x561   : > { %1652 = dma.smem_to_hbm (%p1666_p6), %s2030_s22, 16, %s3118_s3, [#allocation13]  }
 0x562   : > { %1986 = dma.done.wait (%p1666_p6), [#allocation13], 16  }
 0x563   : > { %1988 = vsyncadd (%p1666_p6), [#allocation13], 4294967280 }
 0x564   : > { %1413 = sfence }
 0x565 PF: > { %s19_s21 = sadd.s32 1, %s2019_s21   ;;  %s3242_s0 = smov %s3255_s14 }
 0x566   : > { %p16_p5 = scmp.ge.s32.totalorder %s19_s21, 6   ;;  %s3243_s14 = smov %s1995_s15 }
 0x567   : > { %s3244_s15 = smov %s1999_s16  ;;  %s3245_s16 = smov %s2165_s11 }
 0x568   : > { %s3246_s17 = smov %s2011_s19  ;;  %s3247_s18 = smov %s2015_s20 }
 0x569   : > { %s3248_s19 = smov %s3251_s13  ;;  %s3249_s20 = smov %s3242_s0 }
 0x56a   :  { %18 = sbr.rel (!%p16_p5) target bundleno = 9 (0x9), region = 103 }
 0x571   :  { %1419 = vsyncpa [#allocation12], 1 }
 0x572   :  { %1421 = vsyncpa [#allocation12 + $0x1], 1 }
 0x573   :  { %1422 = vsyncpa [#allocation15], 1 }
 0x574   :  { %1423 = vsyncpa [#allocation13], 1 }
 0x575   :  { %1425 = vsyncpa [#allocation13 + $0x1], 1 }

</bundles_post_ra>
